<compile_context>
chip_gen: v7x
topology: tpu7x:2x2x1
jax: 0.10.0
libtpu: 0.0.40
codegen_flags: <defaults>
</compile_context>

<pallas_src>
import math
import functools

import jax
import jax.numpy as jnp
from jax.experimental import pallas as pl
from jax.experimental.pallas import tpu as pltpu


# ----------------------------- configuration (small synthetic shapes) ----------------
B = 2             # batch
E = 128           # num_embeddings (resnet50 last stage channels; small synthetic)
HF, WF = 8, 8     # spatial size of features[-1]
CDEC = 64         # decoder output channels
H, W = 16, 16     # decoder output spatial size
NSEG = 19         # num_seg_classes
NSEG_PAD = 128    # lane-dense padded seg output channels (sliced back to NSEG)
NID = 512         # num_id_classes  (>= 100 -> scale_factor 64.0)

MARGIN = 0.5
SCALE = 64.0
COS_M = math.cos(MARGIN)
SIN_M = math.sin(MARGIN)
THETA = math.cos(math.pi - MARGIN)
MM = SIN_M * MARGIN


# ----------------------------- kernel 1: segmentation head 3x3 conv ------------------
def _seghead_kernel(x_ref, w_ref, b_ref, o_ref, *, h, w):
    # x_ref: (1, h+2, w+2, C)  padded NHWC tile for one image (VMEM)
    # w_ref: (9, C, NSEG_PAD)  per-(kh,kw) weight slabs
    # b_ref: (1, NSEG_PAD)     padded bias
    # o_ref: (1, h*w, NSEG_PAD)
    c = x_ref.shape[-1]
    n = o_ref.shape[-1]
    # accumulator initialized with the (broadcast) bias; stays in vregs/VMEM
    acc = jnp.broadcast_to(b_ref[...], (h * w, n)).astype(jnp.float32)
    for kh in range(3):
        for kw in range(3):
            # in-kernel im2col: shifted window of the padded tile, flattened to (h*w, C)
            patch = x_ref[0, kh:kh + h, kw:kw + w, :].reshape(h * w, c)
            acc = acc + jnp.dot(patch, w_ref[kh * 3 + kw],
                                preferred_element_type=jnp.float32)
    o_ref[0] = acc


def seg_head(decoder_output, conv_w, conv_b):
    """Conv2d(CDEC, NSEG, kernel_size=3, padding=1); im2col done inside the kernel."""
    b, c, h, w = decoder_output.shape
    n_out = conv_w.shape[0]

    x = jnp.transpose(decoder_output, (0, 2, 3, 1))                 # NHWC
    xp = jnp.pad(x, ((0, 0), (1, 1), (1, 1), (0, 0)))               # (B, h+2, w+2, C)
    # weights: (O, I, kh, kw) -> (kh, kw, I, O) -> (9, C, O) -> pad O to 128 lanes
    wk = jnp.transpose(conv_w, (2, 3, 1, 0)).reshape(9, c, n_out)
    wk = jnp.pad(wk, ((0, 0), (0, 0), (0, NSEG_PAD - n_out)))
    bias = jnp.pad(conv_b, (0, NSEG_PAD - n_out)).reshape(1, NSEG_PAD)

    out = pl.pallas_call(
        functools.partial(_seghead_kernel, h=h, w=w),
        out_shape=jax.ShapeDtypeStruct((b, h * w, NSEG_PAD), jnp.float32),
        grid=(b,),
        in_specs=[
            pl.BlockSpec((1, h + 2, w + 2, c), lambda i: (i, 0, 0, 0)),
            pl.BlockSpec((9, c, NSEG_PAD), lambda i: (0, 0, 0)),
            pl.BlockSpec((1, NSEG_PAD), lambda i: (0, 0)),
        ],
        out_specs=pl.BlockSpec((1, h * w, NSEG_PAD), lambda i: (i, 0, 0)),
        compiler_params=pltpu.CompilerParams(dimension_semantics=("parallel",)),
    )(xp, wk, bias)

    out = out.reshape(b, h, w, NSEG_PAD)[..., :n_out]               # drop lane padding
    return jnp.transpose(out, (0, 3, 1, 2))                         # back to NCHW


# ----------------------- kernel 2: fused embedding head + ArcMarginProduct -----------
def _embed_arcmargin_kernel(lab_ref, f_ref, w_ref, emb_ref, logit_ref):
    # lab_ref:  (B,) int32 labels in SMEM (scalar prefetch)
    # f_ref:    (B, HF*WF, E) channels-last features[-1]
    # w_ref:    (E, NID) ArcMargin kernel (un-normalized)
    # emb_ref:  (B, E)    normalized embeddings
    # logit_ref:(B, NID)  ArcMargin logits
    x = f_ref[...]
    pooled = jnp.mean(x, axis=1)                                    # AdaptiveAvgPool2d + Flatten
    inv_norm = jax.lax.rsqrt(
        jnp.maximum(jnp.sum(pooled * pooled, axis=1, keepdims=True), 1e-24))
    emb = pooled * inv_norm                                         # F.normalize(p=2, dim=1)
    emb_ref[...] = emb

    wk = w_ref[...]
    # scale cosines instead of normalizing the full (E, NID) weight tile
    inv_col = jax.lax.rsqrt(jnp.sum(wk * wk, axis=0, keepdims=True))     # (1, NID)
    cos = jnp.dot(emb, wk, preferred_element_type=jnp.float32) * inv_col
    cos = jnp.clip(cos, -1.0, 1.0)
    sin = jnp.sqrt(jnp.maximum(1.0 - cos * cos, 0.0))
    phi = cos * COS_M - sin * SIN_M
    phi = jnp.where(cos - THETA <= 0.0, cos - MM, phi)              # easy-margin fallback

    cls = jax.lax.broadcasted_iota(jnp.int32, cos.shape, 1)
    row = jax.lax.broadcasted_iota(jnp.int32, cos.shape, 0)
    nb = cos.shape[0]
    target = (row == 0) & (cls == lab_ref[0])
    for bb in range(1, nb):
        target = target | ((row == bb) & (cls == lab_ref[bb]))
    logit_ref[...] = jnp.where(target, phi, cos) * SCALE


def embed_arcmargin(features_last, arc_kernel, labels):
    b, e, hf, wf = features_last.shape
    _, c = arc_kernel.shape
    f = jnp.transpose(features_last, (0, 2, 3, 1)).reshape(b, hf * wf, e)
    labels = labels.astype(jnp.int32)

    emb, logits = pl.pallas_call(
        _embed_arcmargin_kernel,
        out_shape=(jax.ShapeDtypeStruct((b, e), jnp.float32),
                   jax.ShapeDtypeStruct((b, c), jnp.float32)),
        grid_spec=pltpu.PrefetchScalarGridSpec(
            num_scalar_prefetch=1,
            grid=(1,),
            in_specs=[
                pl.BlockSpec((b, hf * wf, e), lambda i, lab: (0, 0, 0)),
                pl.BlockSpec((e, c), lambda i, lab: (0, 0)),
            ],
            out_specs=[
                pl.BlockSpec((b, e), lambda i, lab: (0, 0)),
                pl.BlockSpec((b, c), lambda i, lab: (0, 0)),
            ],
        ),
        compiler_params=pltpu.CompilerParams(dimension_semantics=("arbitrary",)),
    )(labels, f, arc_kernel)
    return emb, logits


# ----------------------------- SegVerID forward (Pallas-backed) ----------------------
def segverid_forward_with_arcmargin(features_last, decoder_output, seg_w, seg_b,
                                    arc_kernel, labels):
    # forward() outputs {'seg_mask', 'id'}; ArcMargin logits (used by loss()) are
    # produced in the same fused embedding kernel so the embeddings never hit HBM twice.
    seg_mask = seg_head(decoder_output, seg_w, seg_b)
    embeddings, logits = embed_arcmargin(features_last, arc_kernel, labels)
    return {"seg_mask": seg_mask, "id": embeddings}, logits


# ----------------------------- main ---------------------------------------------------
if __name__ == "__main__":
    key = jax.random.PRNGKey(0)
    k1, k2, k3, k4, k5 = jax.random.split(key, 5)

    # stand-ins for external smp encoder/decoder outputs (see TODO(synk) above)
    features_last = jax.random.normal(k1, (B, E, HF, WF), jnp.float32)
    decoder_output = jax.random.normal(k2, (B, CDEC, H, W), jnp.float32)

    # segmentation head params: Conv2d(CDEC, NSEG, 3, padding=1)
    seg_w = 0.05 * jax.random.normal(k3, (NSEG, CDEC, 3, 3), jnp.float32)
    seg_b = 0.01 * jnp.arange(NSEG, dtype=jnp.float32)

    # ArcMargin kernel: uniform(-1,1).renorm_(2, 1, 1e-5).mul_(1e5)
    arc_w = jax.random.uniform(k4, (E, NID), jnp.float32, minval=-1.0, maxval=1.0)
    cn = jnp.linalg.norm(arc_w, axis=0, keepdims=True)
    arc_w = arc_w / cn * jnp.minimum(cn, 1e-5) * 1e5

    labels = jax.random.randint(k5, (B,), 0, NID).astype(jnp.int32)

    fwd = jax.jit(segverid_forward_with_arcmargin)
    out, logits = fwd(features_last, decoder_output, seg_w, seg_b, arc_w, labels)
    jax.block_until_ready((out, logits))

    # ---------------- pure-JAX reference checks ----------------
    ref_seg = jax.lax.conv_general_dilated(
        decoder_output, seg_w, (1, 1), "SAME",
        dimension_numbers=("NCHW", "OIHW", "NCHW")) + seg_b[None, :, None, None]

    pooled = jnp.mean(features_last, axis=(2, 3))
    ref_emb = pooled / jnp.maximum(
        jnp.sqrt(jnp.sum(pooled * pooled, axis=1, keepdims=True)), 1e-12)

    wn_ref = arc_w / jnp.linalg.norm(arc_w, axis=0, keepdims=True)
    cos_ref = jnp.clip(ref_emb @ wn_ref, -1.0, 1.0)
    sin_ref = jnp.sqrt(1.0 - cos_ref ** 2)
    phi_ref = cos_ref * COS_M - sin_ref * SIN_M
    phi_ref = jnp.where(cos_ref - THETA <= 0.0, cos_ref - MM, phi_ref)
    onehot = jax.nn.one_hot(labels, NID, dtype=bool)
    ref_logits = jnp.where(onehot, phi_ref, cos_ref) * SCALE

    assert jnp.allclose(out["seg_mask"], ref_seg, atol=1e-3, rtol=1e-3)
    assert jnp.allclose(out["id"], ref_emb, atol=1e-5, rtol=1e-5)
    assert jnp.allclose(logits, ref_logits, atol=1e-3, rtol=1e-3)
    assert out["seg_mask"].shape == (B, NSEG, H, W)
    assert out["id"].shape == (B, E)
    assert logits.shape == (B, NID)

    print("KERNEL_OK")
</pallas_src>

<mosaic_0001>
module attributes {stable_mosaic.version = 11 : i64} {
  func.func @_embed_arcmargin_kernel(%arg0: i32, %arg1: memref<2xi32, #tpu.memory_space<smem>>, %arg2: memref<2x64x128xf32, #tpu.memory_space<vmem>>, %arg3: memref<128x512xf32, #tpu.memory_space<vmem>>, %arg4: memref<2x128xf32, #tpu.memory_space<vmem>>, %arg5: memref<2x512xf32, #tpu.memory_space<vmem>>) attributes {dimension_semantics = [#tpu.dimension_semantics<arbitrary>], iteration_bounds = array<i64: 1>, scalar_prefetch = 1 : i64, scratch_operands = 0 : i64, tpu.core_type = #tpu.core_type<tc>, window_params = [{pipeline_mode = #tpu.pipeline_mode<synchronous>, transform_indices = @transform_0, window_bounds = array<i64: 2, 64, 128>}, {pipeline_mode = #tpu.pipeline_mode<synchronous>, transform_indices = @transform_1, window_bounds = array<i64: 128, 512>}, {pipeline_mode = #tpu.pipeline_mode<synchronous>, transform_indices = @transform_2, window_bounds = array<i64: 2, 128>}, {pipeline_mode = #tpu.pipeline_mode<synchronous>, transform_indices = @transform_3, window_bounds = array<i64: 2, 512>}]} {
    %c0 = arith.constant 0 : index
    %c0_0 = arith.constant 0 : index
    %c0_1 = arith.constant 0 : index
    %0 = vector.load %arg2[%c0, %c0_0, %c0_1] : memref<2x64x128xf32, #tpu.memory_space<vmem>>, vector<2x64x128xf32>
    %cst = arith.constant dense<0.000000e+00> : vector<2x128xf32>
    %1 = vector.multi_reduction <add>, %0, %cst [1] : vector<2x64x128xf32> to vector<2x128xf32>
    %cst_2 = arith.constant 6.400000e+01 : f32
    %2 = vector.broadcast %cst_2 : f32 to vector<2x128xf32>
    %3 = arith.divf %1, %2 : vector<2x128xf32>
    %4 = arith.mulf %3, %3 : vector<2x128xf32>
    %cst_3 = arith.constant dense<0.000000e+00> : vector<2xf32>
    %5 = vector.multi_reduction <add>, %4, %cst_3 [1] : vector<2x128xf32> to vector<2xf32>
    %6 = vector.shape_cast %5 : vector<2xf32> to vector<2x1xf32>
    %cst_4 = arith.constant 1.000000e-24 : f32
    %7 = vector.broadcast %cst_4 : f32 to vector<2x1xf32>
    %8 = arith.maximumf %6, %7 : vector<2x1xf32>
    %9 = math.rsqrt %8 : vector<2x1xf32>
    %10 = vector.broadcast %9 : vector<2x1xf32> to vector<2x128xf32>
    %11 = arith.mulf %3, %10 : vector<2x128xf32>
    %c0_5 = arith.constant 0 : index
    %c0_6 = arith.constant 0 : index
    %12 = vector.load %arg4[%c0_5, %c0_6] : memref<2x128xf32, #tpu.memory_space<vmem>>, vector<2x128xf32>
    tpu.vector_store %arg4[%c0_5, %c0_6], %11 {strides = array<i32>} : memref<2x128xf32, #tpu.memory_space<vmem>>, vector<2x128xf32>,
    %c0_7 = arith.constant 0 : index
    %c0_8 = arith.constant 0 : index
    %13 = vector.load %arg3[%c0_7, %c0_8] : memref<128x512xf32, #tpu.memory_space<vmem>>, vector<128x512xf32>
    %14 = arith.mulf %13, %13 : vector<128x512xf32>
    %cst_9 = arith.constant dense<0.000000e+00> : vector<512xf32>
    %15 = vector.multi_reduction <add>, %14, %cst_9 [0] : vector<128x512xf32> to vector<512xf32>
    %16 = vector.shape_cast %15 : vector<512xf32> to vector<1x512xf32>
    %17 = math.rsqrt %16 : vector<1x512xf32>
    %cst_10 = arith.constant dense<0.000000e+00> : vector<2x512xf32>
    %18 = tpu.matmul %11, %13, %cst_10 {dimension_numbers = #tpu.dot_dimension_numbers<[1], [0], [0], [1], [0, 0, 1, 1], [], []>} : vector<2x128xf32>, vector<128x512xf32>, vector<2x512xf32> -> vector<2x512xf32>
    %19 = vector.broadcast %17 : vector<1x512xf32> to vector<2x512xf32>
    %20 = arith.mulf %18, %19 : vector<2x512xf32>
    %cst_11 = arith.constant -1.000000e+00 : f32
    %cst_12 = arith.constant 1.000000e+00 : f32
    %21 = vector.broadcast %cst_11 : f32 to vector<2x512xf32>
    %22 = arith.maximumf %21, %20 : vector<2x512xf32>
    %23 = vector.broadcast %cst_12 : f32 to vector<2x512xf32>
    %24 = arith.minimumf %23, %22 : vector<2x512xf32>
    %25 = arith.mulf %24, %24 : vector<2x512xf32>
    %cst_13 = arith.constant 1.000000e+00 : f32
    %26 = vector.broadcast %cst_13 : f32 to vector<2x512xf32>
    %27 = arith.subf %26, %25 : vector<2x512xf32>
    %cst_14 = arith.constant 0.000000e+00 : f32
    %28 = vector.broadcast %cst_14 : f32 to vector<2x512xf32>
    %29 = arith.maximumf %27, %28 : vector<2x512xf32>
    %30 = math.sqrt %29 : vector<2x512xf32>
    %cst_15 = arith.constant 0.87758255 : f32
    %31 = vector.broadcast %cst_15 : f32 to vector<2x512xf32>
    %32 = arith.mulf %24, %31 : vector<2x512xf32>
    %cst_16 = arith.constant 0.47942555 : f32
    %33 = vector.broadcast %cst_16 : f32 to vector<2x512xf32>
    %34 = arith.mulf %30, %33 : vector<2x512xf32>
    %35 = arith.subf %32, %34 : vector<2x512xf32>
    %cst_17 = arith.constant -0.87758255 : f32
    %36 = vector.broadcast %cst_17 : f32 to vector<2x512xf32>
    %37 = arith.subf %24, %36 : vector<2x512xf32>
    %cst_18 = arith.constant 0.000000e+00 : f32
    %38 = vector.broadcast %cst_18 : f32 to vector<2x512xf32>
    %39 = arith.cmpf ole, %37, %38 : vector<2x512xf32>
    %cst_19 = arith.constant 0.239712775 : f32
    %40 = vector.broadcast %cst_19 : f32 to vector<2x512xf32>
    %41 = arith.subf %24, %40 : vector<2x512xf32>
    %42 = arith.select %39, %41, %35 : vector<2x512xi1>, vector<2x512xf32>
    %43 = tpu.iota {dimensions = array<i32: 1>} : vector<2x512xi32>
    %44 = tpu.iota {dimensions = array<i32: 0>} : vector<2x512xi32>
    %c0_i32 = arith.constant 0 : i32
    %45 = vector.broadcast %c0_i32 : i32 to vector<2x512xi32>
    %46 = arith.cmpi eq, %44, %45 : vector<2x512xi32>
    %c0_20 = arith.constant 0 : index
    %47 = memref.load %arg1[%c0_20] : memref<2xi32, #tpu.memory_space<smem>>
    %48 = vector.broadcast %47 : i32 to vector<2x512xi32>
    %49 = arith.cmpi eq, %43, %48 : vector<2x512xi32>
    %50 = arith.andi %46, %49 : vector<2x512xi1>
    %c1_i32 = arith.constant 1 : i32
    %51 = vector.broadcast %c1_i32 : i32 to vector<2x512xi32>
    %52 = arith.cmpi eq, %44, %51 : vector<2x512xi32>
    %c1 = arith.constant 1 : index
    %53 = memref.load %arg1[%c1] : memref<2xi32, #tpu.memory_space<smem>>
    %54 = vector.broadcast %53 : i32 to vector<2x512xi32>
    %55 = arith.cmpi eq, %43, %54 : vector<2x512xi32>
    %56 = arith.andi %52, %55 : vector<2x512xi1>
    %57 = arith.ori %50, %56 : vector<2x512xi1>
    %58 = arith.select %57, %42, %24 : vector<2x512xi1>, vector<2x512xf32>
    %cst_21 = arith.constant 6.400000e+01 : f32
    %59 = vector.broadcast %cst_21 : f32 to vector<2x512xf32>
    %60 = arith.mulf %58, %59 : vector<2x512xf32>
    %c0_22 = arith.constant 0 : index
    %c0_23 = arith.constant 0 : index
    %61 = vector.load %arg5[%c0_22, %c0_23] : memref<2x512xf32, #tpu.memory_space<vmem>>, vector<2x512xf32>
    tpu.vector_store %arg5[%c0_22, %c0_23], %60 {strides = array<i32>} : memref<2x512xf32, #tpu.memory_space<vmem>>, vector<2x512xf32>,
    return
  }
  func.func @transform_0(%arg0: i32, %arg1: memref<2xi32, #tpu.memory_space<smem>>) -> (i32, i32, i32) {
    %c0_i32 = arith.constant 0 : i32
    %c0_i32_0 = arith.constant 0 : i32
    %c0_i32_1 = arith.constant 0 : i32
    %c0_i32_2 = arith.constant 0 : i32
    return %c0_i32, %c0_i32_0, %c0_i32_1 : i32, i32, i32
  }
  func.func @transform_1(%arg0: i32, %arg1: memref<2xi32, #tpu.memory_space<smem>>) -> (i32, i32) {
    %c0_i32 = arith.constant 0 : i32
    %c0_i32_0 = arith.constant 0 : i32
    %c0_i32_1 = arith.constant 0 : i32
    return %c0_i32, %c0_i32_0 : i32, i32
  }
  func.func @transform_2(%arg0: i32, %arg1: memref<2xi32, #tpu.memory_space<smem>>) -> (i32, i32) {
    %c0_i32 = arith.constant 0 : i32
    %c0_i32_0 = arith.constant 0 : i32
    %c0_i32_1 = arith.constant 0 : i32
    return %c0_i32, %c0_i32_0 : i32, i32
  }
  func.func @transform_3(%arg0: i32, %arg1: memref<2xi32, #tpu.memory_space<smem>>) -> (i32, i32) {
    %c0_i32 = arith.constant 0 : i32
    %c0_i32_0 = arith.constant 0 : i32
    %c0_i32_1 = arith.constant 0 : i32
    return %c0_i32, %c0_i32_0 : i32, i32
  }
}

module attributes {stable_mosaic.version = 11 : i64} {
  func.func @_seghead_kernel(%arg0: i32, %arg1: memref<1x18x18x64xf32, #tpu.memory_space<vmem>>, %arg2: memref<9x64x128xf32, #tpu.memory_space<vmem>>, %arg3: memref<1x128xf32, #tpu.memory_space<vmem>>, %arg4: memref<1x256x128xf32, #tpu.memory_space<vmem>>) attributes {dimension_semantics = [#tpu.dimension_semantics<parallel>], iteration_bounds = array<i64: 2>, scalar_prefetch = 0 : i64, scratch_operands = 0 : i64, tpu.core_type = #tpu.core_type<tc>, window_params = [{transform_indices = @transform_0, window_bounds = array<i64: 1, 18, 18, 64>}, {pipeline_mode = #tpu.pipeline_mode<synchronous>, transform_indices = @transform_1, window_bounds = array<i64: 9, 64, 128>}, {pipeline_mode = #tpu.pipeline_mode<synchronous>, transform_indices = @transform_2, window_bounds = array<i64: 1, 128>}, {transform_indices = @transform_3, window_bounds = array<i64: 1, 256, 128>}]} {
    %c0 = arith.constant 0 : index
    %c0_0 = arith.constant 0 : index
    %0 = vector.load %arg3[%c0, %c0_0] : memref<1x128xf32, #tpu.memory_space<vmem>>, vector<1x128xf32>
    %1 = vector.shape_cast %0 : vector<1x128xf32> to vector<1x128xf32>
    %2 = vector.broadcast %1 : vector<1x128xf32> to vector<256x128xf32>
    %c0_1 = arith.constant 0 : index
    %c0_2 = arith.constant 0 : index
    %c0_3 = arith.constant 0 : index
    %c0_4 = arith.constant 0 : index
    %3 = vector.load %arg1[%c0_1, %c0_2, %c0_3, %c0_4] : memref<1x18x18x64xf32, #tpu.memory_space<vmem>>, vector<1x16x16x64xf32>
    %4 = vector.shape_cast %3 : vector<1x16x16x64xf32> to vector<16x16x64xf32>
    %5 = vector.shape_cast %4 : vector<16x16x64xf32> to vector<256x64xf32>
    %c0_5 = arith.constant 0 : index
    %c0_6 = arith.constant 0 : index
    %c0_7 = arith.constant 0 : index
    %6 = vector.load %arg2[%c0_5, %c0_6, %c0_7] : memref<9x64x128xf32, #tpu.memory_space<vmem>>, vector<1x64x128xf32>
    %7 = vector.shape_cast %6 : vector<1x64x128xf32> to vector<64x128xf32>
    %cst = arith.constant dense<0.000000e+00> : vector<256x128xf32>
    %8 = tpu.matmul %5, %7, %cst {dimension_numbers = #tpu.dot_dimension_numbers<[1], [0], [0], [1], [0, 0, 1, 1], [], []>} : vector<256x64xf32>, vector<64x128xf32>, vector<256x128xf32> -> vector<256x128xf32>
    %9 = arith.addf %2, %8 : vector<256x128xf32>
    %c0_8 = arith.constant 0 : index
    %c0_9 = arith.constant 0 : index
    %c1 = arith.constant 1 : index
    %c0_10 = arith.constant 0 : index
    %10 = vector.load %arg1[%c0_8, %c0_9, %c1, %c0_10] : memref<1x18x18x64xf32, #tpu.memory_space<vmem>>, vector<1x16x16x64xf32>
    %11 = vector.shape_cast %10 : vector<1x16x16x64xf32> to vector<16x16x64xf32>
    %12 = vector.shape_cast %11 : vector<16x16x64xf32> to vector<256x64xf32>
    %c1_11 = arith.constant 1 : index
    %c0_12 = arith.constant 0 : index
    %c0_13 = arith.constant 0 : index
    %13 = vector.load %arg2[%c1_11, %c0_12, %c0_13] : memref<9x64x128xf32, #tpu.memory_space<vmem>>, vector<1x64x128xf32>
    %14 = vector.shape_cast %13 : vector<1x64x128xf32> to vector<64x128xf32>
    %cst_14 = arith.constant dense<0.000000e+00> : vector<256x128xf32>
    %15 = tpu.matmul %12, %14, %cst_14 {dimension_numbers = #tpu.dot_dimension_numbers<[1], [0], [0], [1], [0, 0, 1, 1], [], []>} : vector<256x64xf32>, vector<64x128xf32>, vector<256x128xf32> -> vector<256x128xf32>
    %16 = arith.addf %9, %15 : vector<256x128xf32>
    %c0_15 = arith.constant 0 : index
    %c0_16 = arith.constant 0 : index
    %c2 = arith.constant 2 : index
    %c0_17 = arith.constant 0 : index
    %17 = vector.load %arg1[%c0_15, %c0_16, %c2, %c0_17] : memref<1x18x18x64xf32, #tpu.memory_space<vmem>>, vector<1x16x16x64xf32>
    %18 = vector.shape_cast %17 : vector<1x16x16x64xf32> to vector<16x16x64xf32>
    %19 = vector.shape_cast %18 : vector<16x16x64xf32> to vector<256x64xf32>
    %c2_18 = arith.constant 2 : index
    %c0_19 = arith.constant 0 : index
    %c0_20 = arith.constant 0 : index
    %20 = vector.load %arg2[%c2_18, %c0_19, %c0_20] : memref<9x64x128xf32, #tpu.memory_space<vmem>>, vector<1x64x128xf32>
    %21 = vector.shape_cast %20 : vector<1x64x128xf32> to vector<64x128xf32>
    %cst_21 = arith.constant dense<0.000000e+00> : vector<256x128xf32>
    %22 = tpu.matmul %19, %21, %cst_21 {dimension_numbers = #tpu.dot_dimension_numbers<[1], [0], [0], [1], [0, 0, 1, 1], [], []>} : vector<256x64xf32>, vector<64x128xf32>, vector<256x128xf32> -> vector<256x128xf32>
    %23 = arith.addf %16, %22 : vector<256x128xf32>
    %c0_22 = arith.constant 0 : index
    %c1_23 = arith.constant 1 : index
    %c0_24 = arith.constant 0 : index
    %c0_25 = arith.constant 0 : index
    %24 = vector.load %arg1[%c0_22, %c1_23, %c0_24, %c0_25] : memref<1x18x18x64xf32, #tpu.memory_space<vmem>>, vector<1x16x16x64xf32>
    %25 = vector.shape_cast %24 : vector<1x16x16x64xf32> to vector<16x16x64xf32>
    %26 = vector.shape_cast %25 : vector<16x16x64xf32> to vector<256x64xf32>
    %c3 = arith.constant 3 : index
    %c0_26 = arith.constant 0 : index
    %c0_27 = arith.constant 0 : index
    %27 = vector.load %arg2[%c3, %c0_26, %c0_27] : memref<9x64x128xf32, #tpu.memory_space<vmem>>, vector<1x64x128xf32>
    %28 = vector.shape_cast %27 : vector<1x64x128xf32> to vector<64x128xf32>
    %cst_28 = arith.constant dense<0.000000e+00> : vector<256x128xf32>
    %29 = tpu.matmul %26, %28, %cst_28 {dimension_numbers = #tpu.dot_dimension_numbers<[1], [0], [0], [1], [0, 0, 1, 1], [], []>} : vector<256x64xf32>, vector<64x128xf32>, vector<256x128xf32> -> vector<256x128xf32>
    %30 = arith.addf %23, %29 : vector<256x128xf32>
    %c0_29 = arith.constant 0 : index
    %c1_30 = arith.constant 1 : index
    %c1_31 = arith.constant 1 : index
    %c0_32 = arith.constant 0 : index
    %31 = vector.load %arg1[%c0_29, %c1_30, %c1_31, %c0_32] : memref<1x18x18x64xf32, #tpu.memory_space<vmem>>, vector<1x16x16x64xf32>
    %32 = vector.shape_cast %31 : vector<1x16x16x64xf32> to vector<16x16x64xf32>
    %33 = vector.shape_cast %32 : vector<16x16x64xf32> to vector<256x64xf32>
    %c4 = arith.constant 4 : index
    %c0_33 = arith.constant 0 : index
    %c0_34 = arith.constant 0 : index
    %34 = vector.load %arg2[%c4, %c0_33, %c0_34] : memref<9x64x128xf32, #tpu.memory_space<vmem>>, vector<1x64x128xf32>
    %35 = vector.shape_cast %34 : vector<1x64x128xf32> to vector<64x128xf32>
    %cst_35 = arith.constant dense<0.000000e+00> : vector<256x128xf32>
    %36 = tpu.matmul %33, %35, %cst_35 {dimension_numbers = #tpu.dot_dimension_numbers<[1], [0], [0], [1], [0, 0, 1, 1], [], []>} : vector<256x64xf32>, vector<64x128xf32>, vector<256x128xf32> -> vector<256x128xf32>
    %37 = arith.addf %30, %36 : vector<256x128xf32>
    %c0_36 = arith.constant 0 : index
    %c1_37 = arith.constant 1 : index
    %c2_38 = arith.constant 2 : index
    %c0_39 = arith.constant 0 : index
    %38 = vector.load %arg1[%c0_36, %c1_37, %c2_38, %c0_39] : memref<1x18x18x64xf32, #tpu.memory_space<vmem>>, vector<1x16x16x64xf32>
    %39 = vector.shape_cast %38 : vector<1x16x16x64xf32> to vector<16x16x64xf32>
    %40 = vector.shape_cast %39 : vector<16x16x64xf32> to vector<256x64xf32>
    %c5 = arith.constant 5 : index
    %c0_40 = arith.constant 0 : index
    %c0_41 = arith.constant 0 : index
    %41 = vector.load %arg2[%c5, %c0_40, %c0_41] : memref<9x64x128xf32, #tpu.memory_space<vmem>>, vector<1x64x128xf32>
    %42 = vector.shape_cast %41 : vector<1x64x128xf32> to vector<64x128xf32>
    %cst_42 = arith.constant dense<0.000000e+00> : vector<256x128xf32>
    %43 = tpu.matmul %40, %42, %cst_42 {dimension_numbers = #tpu.dot_dimension_numbers<[1], [0], [0], [1], [0, 0, 1, 1], [], []>} : vector<256x64xf32>, vector<64x128xf32>, vector<256x128xf32> -> vector<256x128xf32>
    %44 = arith.addf %37, %43 : vector<256x128xf32>
    %c0_43 = arith.constant 0 : index
    %c2_44 = arith.constant 2 : index
    %c0_45 = arith.constant 0 : index
    %c0_46 = arith.constant 0 : index
    %45 = vector.load %arg1[%c0_43, %c2_44, %c0_45, %c0_46] : memref<1x18x18x64xf32, #tpu.memory_space<vmem>>, vector<1x16x16x64xf32>
    %46 = vector.shape_cast %45 : vector<1x16x16x64xf32> to vector<16x16x64xf32>
    %47 = vector.shape_cast %46 : vector<16x16x64xf32> to vector<256x64xf32>
    %c6 = arith.constant 6 : index
    %c0_47 = arith.constant 0 : index
    %c0_48 = arith.constant 0 : index
    %48 = vector.load %arg2[%c6, %c0_47, %c0_48] : memref<9x64x128xf32, #tpu.memory_space<vmem>>, vector<1x64x128xf32>
    %49 = vector.shape_cast %48 : vector<1x64x128xf32> to vector<64x128xf32>
    %cst_49 = arith.constant dense<0.000000e+00> : vector<256x128xf32>
    %50 = tpu.matmul %47, %49, %cst_49 {dimension_numbers = #tpu.dot_dimension_numbers<[1], [0], [0], [1], [0, 0, 1, 1], [], []>} : vector<256x64xf32>, vector<64x128xf32>, vector<256x128xf32> -> vector<256x128xf32>
    %51 = arith.addf %44, %50 : vector<256x128xf32>
    %c0_50 = arith.constant 0 : index
    %c2_51 = arith.constant 2 : index
    %c1_52 = arith.constant 1 : index
    %c0_53 = arith.constant 0 : index
    %52 = vector.load %arg1[%c0_50, %c2_51, %c1_52, %c0_53] : memref<1x18x18x64xf32, #tpu.memory_space<vmem>>, vector<1x16x16x64xf32>
    %53 = vector.shape_cast %52 : vector<1x16x16x64xf32> to vector<16x16x64xf32>
    %54 = vector.shape_cast %53 : vector<16x16x64xf32> to vector<256x64xf32>
    %c7 = arith.constant 7 : index
    %c0_54 = arith.constant 0 : index
    %c0_55 = arith.constant 0 : index
    %55 = vector.load %arg2[%c7, %c0_54, %c0_55] : memref<9x64x128xf32, #tpu.memory_space<vmem>>, vector<1x64x128xf32>
    %56 = vector.shape_cast %55 : vector<1x64x128xf32> to vector<64x128xf32>
    %cst_56 = arith.constant dense<0.000000e+00> : vector<256x128xf32>
    %57 = tpu.matmul %54, %56, %cst_56 {dimension_numbers = #tpu.dot_dimension_numbers<[1], [0], [0], [1], [0, 0, 1, 1], [], []>} : vector<256x64xf32>, vector<64x128xf32>, vector<256x128xf32> -> vector<256x128xf32>
    %58 = arith.addf %51, %57 : vector<256x128xf32>
    %c0_57 = arith.constant 0 : index
    %c2_58 = arith.constant 2 : index
    %c2_59 = arith.constant 2 : index
    %c0_60 = arith.constant 0 : index
    %59 = vector.load %arg1[%c0_57, %c2_58, %c2_59, %c0_60] : memref<1x18x18x64xf32, #tpu.memory_space<vmem>>, vector<1x16x16x64xf32>
    %60 = vector.shape_cast %59 : vector<1x16x16x64xf32> to vector<16x16x64xf32>
    %61 = vector.shape_cast %60 : vector<16x16x64xf32> to vector<256x64xf32>
    %c8 = arith.constant 8 : index
    %c0_61 = arith.constant 0 : index
    %c0_62 = arith.constant 0 : index
    %62 = vector.load %arg2[%c8, %c0_61, %c0_62] : memref<9x64x128xf32, #tpu.memory_space<vmem>>, vector<1x64x128xf32>
    %63 = vector.shape_cast %62 : vector<1x64x128xf32> to vector<64x128xf32>
    %cst_63 = arith.constant dense<0.000000e+00> : vector<256x128xf32>
    %64 = tpu.matmul %61, %63, %cst_63 {dimension_numbers = #tpu.dot_dimension_numbers<[1], [0], [0], [1], [0, 0, 1, 1], [], []>} : vector<256x64xf32>, vector<64x128xf32>, vector<256x128xf32> -> vector<256x128xf32>
    %65 = arith.addf %58, %64 : vector<256x128xf32>
    %c0_64 = arith.constant 0 : index
    %c0_65 = arith.constant 0 : index
    %c0_66 = arith.constant 0 : index
    %66 = vector.load %arg4[%c0_64, %c0_65, %c0_66] : memref<1x256x128xf32, #tpu.memory_space<vmem>>, vector<1x256x128xf32>
    %67 = vector.shape_cast %66 : vector<1x256x128xf32> to vector<256x128xf32>
    %68 = vector.shape_cast %65 : vector<256x128xf32> to vector<1x256x128xf32>
    tpu.vector_store %arg4[%c0_64, %c0_65, %c0_66], %68 {strides = array<i32>} : memref<1x256x128xf32, #tpu.memory_space<vmem>>, vector<1x256x128xf32>,
    return
  }
  func.func @transform_0(%arg0: i32) -> (i32, i32, i32, i32) {
    %c0_i32 = arith.constant 0 : i32
    %c0_i32_0 = arith.constant 0 : i32
    %c0_i32_1 = arith.constant 0 : i32
    %c0_i32_2 = arith.constant 0 : i32
    return %arg0, %c0_i32, %c0_i32_0, %c0_i32_1 : i32, i32, i32, i32
  }
  func.func @transform_1(%arg0: i32) -> (i32, i32, i32) {
    %c0_i32 = arith.constant 0 : i32
    %c0_i32_0 = arith.constant 0 : i32
    %c0_i32_1 = arith.constant 0 : i32
    %c0_i32_2 = arith.constant 0 : i32
    return %c0_i32, %c0_i32_0, %c0_i32_1 : i32, i32, i32
  }
  func.func @transform_2(%arg0: i32) -> (i32, i32) {
    %c0_i32 = arith.constant 0 : i32
    %c0_i32_0 = arith.constant 0 : i32
    %c0_i32_1 = arith.constant 0 : i32
    return %c0_i32, %c0_i32_0 : i32, i32
  }
  func.func @transform_3(%arg0: i32) -> (i32, i32, i32) {
    %c0_i32 = arith.constant 0 : i32
    %c0_i32_0 = arith.constant 0 : i32
    %c0_i32_1 = arith.constant 0 : i32
    return %arg0, %c0_i32, %c0_i32_0 : i32, i32, i32
  }
}

</mosaic_0001>

<bundles_post_ra>
// kernel: segverid_forward_with_arcmargin.3
= control target key start
LH: loop header
LB: loop body
LE: loop exit
PB: predicated region body
PF: predicated region fallthrough
CT: control target
= control target key end

     0   :  { %s1118_s0 = inlined_call_operand.vmem [shape: s32[2], index: 0, kind: input, shape index: {}]   ;;  %s1119_s1 = inlined_call_operand.hbm [shape: f32[2,64,128], index: 1, kind: input, shape index: {}]   ;;  %s1120_s2 = inlined_call_operand.hbm [shape: f32[128,512], index: 2, kind: input, shape index: {}]   ;;  %s1121_s3 = inlined_call_operand.hbm [shape: f32[2,128], index: 3, kind: output, shape index: {0}]   ;;  %s1122_s4 = inlined_call_operand.hbm [shape: f32[2,512], index: 4, kind: output, shape index: {1}]  }
   0x1   :  { %s10_s17 = sshll.u32 %s1118_s0, 4  ;;  %s11_s17 = int_to_ptr.vmem [resolvable:$true] %s10_s17 }
   0x2   :  { %s758_s18 = scalar_lea.vmem %s11_s17, 16  ;;  %p763_p1 = scmp.lt.s32.totalorder %s11_s17, %s11_s17 }
   0x3   :  { %p759_p0 = scmp.ne.s32.totalorder %s11_s17, %s758_s18  ;;  %p764_p2 = scmp.lt.s32.totalorder %s758_s18, %s758_s18 }
   0x5   :  { %p765_p3 = por %p764_p2, %p763_p1 }
   0x7   :  { %p766_p4 = pnand %p765_p3, %p759_p0 }
   0x9   :  { %769 = shalt.err (!%p766_p4)  }
   0xa   :  { %s868_s19 = smov [#allocation3]  }
   0xb   :  { %13 = dma.vmem_to_smem %s11_s17, 16, %s868_s19, [#allocation2] }
   0xc   :  { %858 = dma.done.wait [#allocation2], 16 }
   0xd   :  { %859 = vsyncadd [#allocation2], 4294967280 }
   0xe   :  { %15 = sfence }
   0xf   :  { %16 = vsyncpa [#allocation5], 0 }
  0x10   :  { %17 = vsyncpa [#allocation8], 0 }
  0x11   :  { %18 = vsyncpa [#allocation6], 0 }
  0x12   :  { %19 = vsyncpa [#allocation11], 0  ;;  %s869_s20 = smov [#allocation4]   ;;  %s770_s23 = scalar_lea.hbm %s1119_s1, 2048 }
  0x13   :  { %s25_s21 = sshll.u32 %s869_s20, 4  ;;  %p771_p5 = scmp.ne.s32.totalorder %s1119_s1, %s770_s23  ;;  %s26_s21 = int_to_ptr.vmem [resolvable:$true] %s25_s21 }
  0x14   :  { %p774_p6 = scmp.lt.u32.totalorder %s770_s23, %s1119_s1 }
  0x16   :  { %p776_p7 = pnand %p774_p6, %p771_p5 }
  0x18   :  { %779 = shalt.err (!%p776_p7)
}
  0x19   :  { %s780_s28 = scalar_lea.vmem %s26_s21, 2048  ;;  %p785_p9 = scmp.lt.s32.totalorder %s26_s21, %s26_s21 }
  0x1a   :  { %p781_p8 = scmp.ne.s32.totalorder %s26_s21, %s780_s28  ;;  %p786_p10 = scmp.lt.s32.totalorder %s780_s28, %s780_s28 }
  0x1c   :  { %p787_p11 = por %p786_p10, %p785_p9 }
  0x1e   :  { %p788_p12 = pnand %p787_p11, %p781_p8 }
  0x20   :  { %791 = shalt.err (!%p788_p12)
}
  0x21   :  { %s870_s29 = smov 128   ;;  %s871_s30 = smov 8  }
  0x22   :  { %31 = dma.hbm_to_vmem [thread:$0]  %s1119_s1, 2048, %s26_s21, [#allocation5], %s870_s29, %s870_s29, %s871_s30  }
  0x23   :  { %s872_s7 = smov [#allocation7]   ;;  %s792_s11 = scalar_lea.hbm %s1120_s2, 8192 }
  0x24   :  { %s37_s8 = sshll.u32 %s872_s7, 4  ;;  %p793_p13 = scmp.ne.s32.totalorder %s1120_s2, %s792_s11  ;;  %s38_s8 = int_to_ptr.vmem [resolvable:$true] %s37_s8 }
  0x25   :  { %p796_p0 = scmp.lt.u32.totalorder %s792_s11, %s1120_s2 }
  0x27   :  { %p798_p1 = pnand %p796_p0, %p793_p13 }
  0x29   :  { %801 = shalt.err (!%p798_p1)
}
  0x2a   :  { %s802_s16 = scalar_lea.vmem %s38_s8, 8192  ;;  %p807_p3 = scmp.lt.s32.totalorder %s38_s8, %s38_s8 }
  0x2b   :  { %p803_p2 = scmp.ne.s32.totalorder %s38_s8, %s802_s16  ;;  %p808_p4 = scmp.lt.s32.totalorder %s802_s16, %s802_s16 }
  0x2d   :  { %p809_p5 = por %p808_p4, %p807_p3 }
  0x2f   :  { %p810_p6 = pnand %p809_p5, %p803_p2 }
  0x31   :  { %813 = shalt.err (!%p810_p6)
}
  0x32   :  { %s873_s1 = smov 512   ;;  %s874_s17 = smov 32  }
  0x33   :  { %43 = dma.hbm_to_vmem [thread:$0]  %s1120_s2, 8192, %s38_s8, [#allocation8], %s873_s1, %s873_s1, %s874_s17  }
  0x34   :  { %860 = dma.done.wait [#allocation5], 2048  }
  0x35   :  { %861 = vsyncadd [#allocation5], 4294965248 }
  0x36   :  { %862 = dma.done.wait [#allocation8], 8192  }
  0x37   :  { %863 = vsyncadd [#allocation8], 4294959104  ;;  %v50_v0 = vld [vmem:[#allocation4] sm:$0xff]  ;;  %v51_v1 = vld [vmem:[#allocation4 + $0x8] sm:$0xff]  ;;  %vm99_vm0 = vcmask 1041409   ;;  %vm102_vm1 = vcmask 1041408  }
  0x38   :  { %v52_v2 = vld [vmem:[#allocation4 + $0x10] sm:$0xff]  ;;  %v66_v3 = vadd.f32 %v51_v1, %v50_v0  ;;  %v53_v4 = vld [vmem:[#allocation4 + $0x18] sm:$0xff]  ;;  %v58_v5 = vld [vmem:[#allocation4 + $0x40] sm:$0xff]  ;;  %s876_s2 = smov [#allocation9]  }
  0x39   :  { %v59_v6 = vld [vmem:[#allocation4 + $0x48] sm:$0xff]  ;;  %v60_v7 = vld [vmem:[#allocation4 + $0x50] sm:$0xff]  ;;  %v54_v9 = vld [vmem:[#allocation4 + $0x20] sm:$0xff]  ;;  %s628_s20 = sshll.u32 %s876_s2, 4  ;;  %s629_s20 = int_to_ptr.vmem [resolvable:$true] %s628_s20 }
  0x3a   :  { %v67_v8 = vadd.f32 %v66_v3, %v52_v2  ;;  %v55_v10 = vld [vmem:[#allocation4 + $0x28] sm:$0xff]  ;;  %v61_v11 = vld [vmem:[#allocation4 + $0x58] sm:$0xff]  ;;  %v79_v12 = vadd.f32 %v59_v6, %v58_v5  ;;  %v62_v13 = vld [vmem:[#allocation4 + $0x60] sm:$0xff]  ;;  %s814_s21 = scalar_lea.vmem %s629_s20, 32  ;;  %p819_p8 = scmp.lt.s32.totalorder %s629_s20, %s629_s20 }
  0x3b   :  { %v121_v15 = vld [vmem:[#allocation7 + $0x8] sm:$0xff]  ;;  %v123_v21 = vld [vmem:[#allocation7 + $0x18] sm:$0xff]  ;;  %v120_v23 = vld [vmem:[#allocation7] sm:$0xff]  ;;  %p815_p7 = scmp.ne.s32.totalorder %s629_s20, %s814_s21  ;;  %p820_p9 = scmp.lt.s32.totalorder %s814_s21, %s814_s21 }
  0x3c   :  { %v68_v14 = vadd.f32 %v67_v8, %v53_v4  ;;  %v125_v16 = vld [vmem:[#allocation7 + $0x28] sm:$0xff]  ;;  %v80_v17 = vadd.f32 %v79_v12, %v60_v7  ;;  %v185_v18 = vmul.f32 %v121_v15, %v121_v15  ;;  %v127_v22 = vld [vmem:[#allocation7 + $0x38] sm:$0xff]  ;;  %v187_v25 = vmul.f32 %v123_v21, %v123_v21  ;;  %v124_v28 = vld [vmem:[#allocation7 + $0x20] sm:$0xff] }
  0x3d   :  { %v189_v19 = vmul.f32 %v125_v16, %v125_v16  ;;  %v665_v20 = vpack.c.bf16 %v125_v16, %v121_v15  ;;  %v191_v26 = vmul.f32 %v127_v22, %v127_v22  ;;  %v697_v27 = vpack.c.bf16 %v127_v22, %v123_v21  ;;  %v122_v29 = vld [vmem:[#allocation7 + $0x10] sm:$0xff]  ;;  %v129_v36 = vld [vmem:[#allocation7 + $0x48] sm:$0xff]  ;;  %v57_v43 = vld [vmem:[#allocation4 + $0x38] sm:$0xff]  ;;  %p821_p10 = por %p820_p9, %p819_p8 }
  0x3e   :  { %v69_v24 = vadd.f32 %v68_v14, %v54_v9  ;;  %v126_v30 = vld [vmem:[#allocation7 + $0x30] sm:$0xff]  ;;  %v81_v32 = vadd.f32 %v80_v17, %v61_v11  ;;  %v184_v34 = vmul.f32 %v120_v23, %v120_v23  ;;  %v188_v35 = vmul.f32 %v124_v28, %v124_v28  ;;  %v133_v37 = vld [vmem:[#allocation7 + $0x68] sm:$0xff]  ;;  %v131_v48 = vld [vmem:[#allocation7 + $0x58] sm:$0xff] }
  0x3f   :  { %v56_v31 = vld [vmem:[#allocation4 + $0x30] sm:$0xff]  ;;  %v269_v33 = vadd.f32 %v189_v19, %v185_v18  ;;  %666 = vmatprep.subr.bf16.mxu0 %v665_v20  ;;  %v63_v38 = vld [vmem:[#allocation4 + $0x68] sm:$0xff]  ;;  %v311_v40 = vadd.f32 %v191_v26, %v187_v25  ;;  %698 = vmatprep.subr.bf16.mxu1 %v697_v27  ;;  %v667_v41 = vpack.c.bf16 %v124_v28, %v120_v23  ;;  %v135_v49 = vld [vmem:[#allocation7 + $0x78] sm:$0xff]  ;;  %p822_p11 = pnand %p821_p10, %p815_p7 }
  0x40   :  { %v70_v39 = vadd.f32 %v69_v24, %v55_v10  ;;  %v186_v42 = vmul.f32 %v122_v29, %v122_v29  ;;  %v82_v44 = vadd.f32 %v81_v32, %v62_v13  ;;  %v248_v45 = vadd.f32 %v188_v35, %v184_v34  ;;  %v64_v50 = vld [vmem:[#allocation4 + $0x70] sm:$0xff]  ;;  %v128_v55 = vld [vmem:[#allocation7 + $0x40] sm:$0xff]  ;;  %v65_v61 = vld [vmem:[#allocation4 + $0x78] sm:$0xff] }
  0x41   :  { %v190_v46 = vmul.f32 %v126_v30, %v126_v30  ;;  %v699_v47 = vpack.c.bf16 %v126_v30, %v122_v29  ;;  %668 = vmatpush1.bf16.msra.mxu0 %v667_v41  ;;  %v193_v52 = vmul.f32 %v129_v36, %v129_v36  ;;  %v197_v53 = vmul.f32 %v133_v37, %v133_v37  ;;  %v132_v56 = vld [vmem:[#allocation7 + $0x60] sm:$0xff]  ;;  %v130_v2 = vld [vmem:[#allocation7 + $0x50] sm:$0xff]  ;;  %v137_v12 = vld [vmem:[#allocation7 + $0x88] sm:$0xff] }
  0x42   :  { %v71_v51 = vadd.f32 %v70_v39, %v56_v31  ;;  %v669_v54 = vpack.c.bf16 %v133_v37, %v129_v36  ;;  %v83_v57 = vadd.f32 %v82_v44, %v63_v38  ;;  %v195_v59 = vmul.f32 %v131_v48, %v131_v48  ;;  %v134_v3 = vld [vmem:[#allocation7 + $0x70] sm:$0xff]  ;;  %v141_v13 = vld [vmem:[#allocation7 + $0xa8] sm:$0xff]  ;;  %v139_v22 = vld [vmem:[#allocation7 + $0x98] sm:$0xff] }
  0x43   :  { %v290_v58 = vadd.f32 %v190_v46, %v186_v42  ;;  %700 = vmatpush1.bf16.msra.mxu1 %v699_v47  ;;  %v199_v60 = vmul.f32 %v135_v49, %v135_v49  ;;  %v270_v63 = vadd.f32 %v269_v33, %v193_v52  ;;  %v701_v0 = vpack.c.bf16 %v135_v49, %v131_v48  ;;  %v143_v23 = vld [vmem:[#allocation7 + $0xb8] sm:$0xff]  ;;  %v136_v28 = vld [vmem:[#allocation7 + $0x80] sm:$0xff]  ;;  %v138_v38 = vld [vmem:[#allocation7 + $0x90] sm:$0xff] }
  0x44   :  { %v72_v62 = vadd.f32 %v71_v51, %v57_v43  ;;  %670 = vmatprep.subr.bf16.mxu0 %v669_v54  ;;  %v192_v1 = vmul.f32 %v128_v55, %v128_v55  ;;  %v84_v4 = vadd.f32 %v83_v57, %v64_v50  ;;  %v312_v5 = vadd.f32 %v311_v40, %v195_v59  ;;  %v140_v29 = vld [vmem:[#allocation7 + $0xa0] sm:$0xff]  ;;  %v142_v39 = vld [vmem:[#allocation7 + $0xb0] sm:$0xff] }
  0x45   :  { %v196_v6 = vmul.f32 %v132_v56, %v132_v56  ;;  %v671_v7 = vpack.c.bf16 %v132_v56, %v128_v55  ;;  %v271_v9 = vadd.f32 %v270_v63, %v197_v53  ;;  %702 = vmatprep.subr.bf16.mxu1 %v701_v0  ;;  %v194_v11 = vmul.f32 %v130_v2, %v130_v2  ;;  %v145_v0 = vld [vmem:[#allocation7 + $0xc8] sm:$0xff] }
  0x46   :  { %v73_v8 = vrot.slane %v72_v62, 4  ;;  %v249_v10 = vadd.f32 %v248_v45, %v192_v1  ;;  %v85_v14 = vadd.f32 %v84_v4, %v65_v61  ;;  %v313_v15 = vadd.f32 %v312_v5, %v199_v60  ;;  %v149_v1 = vld [vmem:[#allocation7 + $0xe8] sm:$0xff]  ;;  %v151_v4 = vld [vmem:[#allocation7 + $0xf8] sm:$0xff]  ;;  %v144_v5 = vld [vmem:[#allocation7 + $0xc0] sm:$0xff] }
  0x47   :  { %672 = vmatpush1.bf16.msra.mxu0 %v671_v7  ;;  %v198_v16 = vmul.f32 %v134_v3, %v134_v3  ;;  %v703_v17 = vpack.c.bf16 %v134_v3, %v130_v2  ;;  %v291_v20 = vadd.f32 %v290_v58, %v194_v11  ;;  %v201_v21 = vmul.f32 %v137_v12, %v137_v12  ;;  %v147_v2 = vld [vmem:[#allocation7 + $0xd8] sm:$0xff] }
  0x48   :  { %v74_v18 = vadd.f32 %v73_v8, %v72_v62  ;;  %v250_v19 = vadd.f32 %v249_v10, %v196_v6  ;;  %v86_v24 = vrot.slane %v85_v14, 4  ;;  %v205_v25 = vmul.f32 %v141_v13, %v141_v13  ;;  %v148_v6 = vld [vmem:[#allocation7 + $0xe0] sm:$0xff]  ;;  %v150_v10 = vld [vmem:[#allocation7 + $0xf0] sm:$0xff] }
  0x49   :  { %704 = vmatpush1.bf16.msra.mxu1 %v703_v17  ;;  %v673_v26 = vpack.c.bf16 %v141_v13, %v137_v12  ;;  %v203_v27 = vmul.f32 %v139_v22, %v139_v22  ;;  %v292_v31 = vadd.f32 %v291_v20, %v198_v16  ;;  %v272_v32 = vadd.f32 %v271_v9, %v201_v21  ;;  %v146_v9 = vld [vmem:[#allocation7 + $0xd0] sm:$0xff]  ;;  %v153_v16 = vld [vmem:[#allocation7 + $0x108] sm:$0xff] }
  0x4a   :  { %v75_v30 = vrot.slane %v74_v18, 2  ;;  %v207_v33 = vmul.f32 %v143_v23, %v143_v23  ;;  %v87_v34 = vadd.f32 %v86_v24, %v85_v14  ;;  %v705_v36 = vpack.c.bf16 %v143_v23, %v139_v22  ;;  %v157_v17 = vld [vmem:[#allocation7 + $0x128] sm:$0xff]  ;;  %v155_v22 = vld [vmem:[#allocation7 + $0x118] sm:$0xff] }
  0x4b   :  { %674 = vmatprep.subr.bf16.mxu0 %v673_v26  ;;  %v314_v35 = vadd.f32 %v313_v15, %v203_v27  ;;  %v200_v37 = vmul.f32 %v136_v28, %v136_v28  ;;  %v273_v41 = vadd.f32 %v272_v32, %v205_v25  ;;  %v204_v42 = vmul.f32 %v140_v29, %v140_v29  ;;  %v159_v23 = vld [vmem:[#allocation7 + $0x138] sm:$0xff]  ;;  %v152_v32 = vld [vmem:[#allocation7 + $0x100] sm:$0xff] }
  0x4c   :  { %v76_v40 = vadd.f32 %v75_v30, %v74_v18  ;;  %v675_v43 = vpack.c.bf16 %v140_v29, %v136_v28  ;;  %v88_v44 = vrot.slane %v87_v34, 2  ;;  %706 = vmatprep.subr.bf16.mxu1 %v705_v36  ;;  %v202_v47 = vmul.f32 %v138_v38, %v138_v38 }
  0x4d   :  { %v315_v45 = vadd.f32 %v314_v35, %v207_v33  ;;  %v251_v46 = vadd.f32 %v250_v19, %v200_v37  ;;  %v206_v49 = vmul.f32 %v142_v39, %v142_v39  ;;  %v707_v50 = vpack.c.bf16 %v142_v39, %v138_v38  ;;  %v156_v33 = vld [vmem:[#allocation7 + $0x120] sm:$0xff]  ;;  %v154_v38 = vld [vmem:[#allocation7 + $0x110] sm:$0xff] }
  0x4e   :  { %v77_v48 = vrot.slane %v76_v40, 1  ;;  %676 = vmatpush1.bf16.msra.mxu0 %v675_v43  ;;  %v89_v51 = vadd.f32 %v88_v44, %v87_v34  ;;  %v293_v53 = vadd.f32 %v292_v31, %v202_v47  ;;  %v677_v3 = vpack.c.bf16 %v149_v1, %v145_v0  ;;  %v158_v39 = vld [vmem:[#allocation7 + $0x130] sm:$0xff] }
  0x4f   :  { %v252_v52 = vadd.f32 %v251_v46, %v204_v42  ;;  %708 = vmatpush1.bf16.msra.mxu1 %v707_v50  ;;  %v709_v7 = vpack.c.bf16 %v151_v4, %v147_v2  ;;  %v679_v8 = vpack.c.bf16 %v148_v6, %v144_v5  ;;  %v711_v11 = vpack.c.bf16 %v150_v10, %v146_v9 }
  0x50   :  { %v78_v54 = vadd.f32 %v77_v48, %v76_v40  ;;  %v90_v55 = vrot.slane %v89_v51, 1  ;;  %v294_v56 = vadd.f32 %v293_v53, %v206_v49  ;;  %678 = vmatprep.subr.bf16.mxu0 %v677_v3  ;;  %v209_v12 = vmul.f32 %v145_v0, %v145_v0  ;;  %v161_v48 = vld [vmem:[#allocation7 + $0x148] sm:$0xff] }
  0x51   :  { %710 = vmatprep.subr.bf16.mxu1 %v709_v7  ;;  %v213_v13 = vmul.f32 %v149_v1, %v149_v1  ;;  %v211_v14 = vmul.f32 %v147_v2, %v147_v2  ;;  %v215_v15 = vmul.f32 %v151_v4, %v151_v4  ;;  %v208_v18 = vmul.f32 %v144_v5, %v144_v5  ;;  %v165_v49 = vld [vmem:[#allocation7 + $0x168] sm:$0xff]  ;;  %v162_v4 = vld [vmem:[#allocation7 + $0x150] sm:$0xff] }
  0x52   :  { %v931_v57 = vmul.f32 0.015625, %v78_v54  ;;  %v91_v58 = vadd.f32 %v90_v55, %v89_v51  ;;  %680 = vmatpush1.bf16.msra.mxu0 %v679_v8  ;;  %v212_v19 = vmul.f32 %v148_v6, %v148_v6  ;;  %v210_v20 = vmul.f32 %v146_v9, %v146_v9  ;;  %v163_v54 = vld [vmem:[#allocation7 + $0x158] sm:$0xff]  ;;  %v166_v5 = vld [vmem:[#allocation7 + $0x170] sm:$0xff] }
  0x53   :  { %712 = vmatpush1.bf16.msra.mxu1 %v711_v11  ;;  %v214_v21 = vmul.f32 %v150_v10, %v150_v10  ;;  %v274_v24 = vadd.f32 %v273_v41, %v209_v12  ;;  %v316_v25 = vadd.f32 %v315_v45, %v211_v14  ;;  %v217_v26 = vmul.f32 %v153_v16, %v153_v16  ;;  %v167_v55 = vld [vmem:[#allocation7 + $0x178] sm:$0xff]  ;;  %v169_v14 = vld [vmem:[#allocation7 + $0x188] sm:$0xff] }
  0x54   :  { %v933_v59 = vmul.f32 0.015625, %v91_v58  ;;  %v95_v60 = vmul.f32 %v931_v57, %v931_v57  ;;  %v221_v27 = vmul.f32 %v157_v17, %v157_v17  ;;  %v253_v28 = vadd.f32 %v252_v52, %v208_v18 }
  0x55   :  { %v295_v29 = vadd.f32 %v294_v56, %v210_v20  ;;  %v681_v30 = vpack.c.bf16 %v157_v17, %v153_v16  ;;  %v219_v31 = vmul.f32 %v155_v22, %v155_v22  ;;  %v275_v34 = vadd.f32 %v274_v24, %v213_v13  ;;  %v171_v20 = vld [vmem:[#allocation7 + $0x198] sm:$0xff] }
  0x56   :  { %v96_v61 = vmul.f32 %v933_v59, %v933_v59  ;;  %v317_v35 = vadd.f32 %v316_v25, %v215_v15  ;;  %v223_v36 = vmul.f32 %v159_v23, %v159_v23  ;;  %v713_v37 = vpack.c.bf16 %v159_v23, %v155_v22  ;;  %v173_v15 = vld [vmem:[#allocation7 + $0x1a8] sm:$0xff] }
  0x57   :  { %v254_v40 = vadd.f32 %v253_v28, %v212_v19  ;;  %v296_v42 = vadd.f32 %v295_v29, %v214_v21  ;;  %682 = vmatprep.subr.bf16.mxu0 %v681_v30  ;;  %v216_v43 = vmul.f32 %v152_v32, %v152_v32  ;;  %v220_v41 = vmul.f32 %v156_v33, %v156_v33  ;;  %v175_v21 = vld [vmem:[#allocation7 + $0x1b8] sm:$0xff] }
  0x58   :  { %v100_v62 = vsel %vm99_vm0, %v96_v61, %v95_v60  ;;  %v276_v44 = vadd.f32 %v275_v34, %v217_v26  ;;  %v318_v45 = vadd.f32 %v317_v35, %v219_v31  ;;  %714 = vmatprep.subr.bf16.mxu1 %v713_v37  ;;  %v683_v46 = vpack.c.bf16 %v156_v33, %v152_v32  ;;  %v168_v26 = vld [vmem:[#allocation7 + $0x180] sm:$0xff]  ;;  %v170_v32 = vld [vmem:[#allocation7 + $0x190] sm:$0xff] }
  0x59   :  { %v103_v63 = vsel %vm102_vm1, %v100_v62, 0.0  ;;  %v218_v47 = vmul.f32 %v154_v38, %v154_v38  ;;  %v255_v50 = vadd.f32 %v254_v40, %v216_v43  ;;  %v222_v51 = vmul.f32 %v158_v39, %v158_v39  ;;  %v160_v62 = vld [vmem:[#allocation7 + $0x140] sm:$0xff]  ;;  %v174_v33 = vld [vmem:[#allocation7 + $0x1b0] sm:$0xff]  ;;  %v177_v43 = vld [vmem:[#allocation7 + $0x1c8] sm:$0xff] }
  0x5a   :  { %104 = vadd.xlane.f32.xlu0 %v103_v63  ;;  %v715_v52 = vpack.c.bf16 %v158_v39, %v154_v38  ;;  %v225_v53 = vmul.f32 %v161_v48, %v161_v48  ;;  %v277_v56 = vadd.f32 %v276_v44, %v221_v27  ;;  %v319_v58 = vadd.f32 %v318_v45, %v223_v36  ;;  %v164_v63 = vld [vmem:[#allocation7 + $0x160] sm:$0xff] }
  0x5b   :  { %684 = vmatpush1.bf16.msra.mxu0 %v683_v46  ;;  %v297_v60 = vadd.f32 %v296_v42, %v218_v47  ;;  %v229_v61 = vmul.f32 %v165_v49, %v165_v49  ;;  %v256_v0 = vadd.f32 %v255_v50, %v220_v41  ;;  %v685_v1 = vpack.c.bf16 %v165_v49, %v161_v48  ;;  %v172_v27 = vld [vmem:[#allocation7 + $0x1a0] sm:$0xff]  ;;  %v181_v41 = vld [vmem:[#allocation7 + $0x1e8] sm:$0xff]  ;;  %v179_v48 = vld [vmem:[#allocation7 + $0x1d8] sm:$0xff] }
  0x5c   :  { %716 = vmatpush1.bf16.msra.mxu1 %v715_v52  ;;  %v227_v2 = vmul.f32 %v163_v54, %v163_v54  ;;  %v231_v3 = vmul.f32 %v167_v55, %v167_v55  ;;  %v278_v7 = vadd.f32 %v277_v56, %v225_v53  ;;  %v717_v8 = vpack.c.bf16 %v167_v55, %v163_v54  ;;  %v183_v49 = vld [vmem:[#allocation7 + $0x1f8] sm:$0xff]  ;;  %v176_v54 = vld [vmem:[#allocation7 + $0x1c0] sm:$0xff] }
  0x5d   :  { %v298_v6 = vadd.f32 %v297_v60, %v222_v51  ;;  %v224_v9 = vmul.f32 %v160_v62, %v160_v62  ;;  %686 = vmatprep.subr.bf16.mxu0 %v685_v1  ;;  %v228_v11 = vmul.f32 %v164_v63, %v164_v63  ;;  %v687_v12 = vpack.c.bf16 %v164_v63, %v160_v62  ;;  %v180_v55 = vld [vmem:[#allocation7 + $0x1e0] sm:$0xff]  ;;  %v178_v62 = vld [vmem:[#allocation7 + $0x1d0] sm:$0xff] }
  0x5e   :  { %v320_v10 = vadd.f32 %v319_v58, %v227_v2  ;;  %v226_v13 = vmul.f32 %v162_v4, %v162_v4  ;;  %v279_v16 = vadd.f32 %v278_v7, %v229_v61  ;;  %718 = vmatprep.subr.bf16.mxu1 %v717_v8  ;;  %v230_v18 = vmul.f32 %v166_v5, %v166_v5  ;;  %v182_v63 = vld [vmem:[#allocation7 + $0x1f0] sm:$0xff] }
  0x5f   :  { %v257_v17 = vadd.f32 %v256_v0, %v224_v9  ;;  %v719_v19 = vpack.c.bf16 %v166_v5, %v162_v4  ;;  %688 = vmatpush1.bf16.msra.mxu0 %v687_v12  ;;  %v233_v24 = vmul.f32 %v169_v14, %v169_v14  ;;  %v237_v25 = vmul.f32 %v173_v15, %v173_v15 }
  0x60   :  { %v321_v22 = vadd.f32 %v320_v10, %v231_v3  ;;  %v299_v23 = vadd.f32 %v298_v6, %v226_v13  ;;  %v689_v29 = vpack.c.bf16 %v173_v15, %v169_v14  ;;  %v235_v30 = vmul.f32 %v171_v20, %v171_v20 }
  0x61   :  { %v258_v28 = vadd.f32 %v257_v17, %v228_v11  ;;  %720 = vmatpush1.bf16.msra.mxu1 %v719_v19  ;;  %v239_v31 = vmul.f32 %v175_v21, %v175_v21  ;;  %v280_v35 = vadd.f32 %v279_v16, %v233_v24  ;;  %v721_v36 = vpack.c.bf16 %v175_v21, %v171_v20 }
  0x62   :  { %v300_v34 = vadd.f32 %v299_v23, %v230_v18  ;;  %v232_v37 = vmul.f32 %v168_v26, %v168_v26  ;;  %690 = vmatprep.subr.bf16.mxu0 %v689_v29  ;;  %v322_v38 = vadd.f32 %v321_v22, %v235_v30  ;;  %v236_v39 = vmul.f32 %v172_v27, %v172_v27 }
  0x63   :  { %v691_v40 = vpack.c.bf16 %v172_v27, %v168_v26  ;;  %v234_v42 = vmul.f32 %v170_v32, %v170_v32  ;;  %v281_v44 = vadd.f32 %v280_v35, %v237_v25  ;;  %722 = vmatprep.subr.bf16.mxu1 %v721_v36  ;;  %v238_v46 = vmul.f32 %v174_v33, %v174_v33 }
  0x64   :  { %v259_v45 = vadd.f32 %v258_v28, %v232_v37  ;;  %v723_v47 = vpack.c.bf16 %v174_v33, %v170_v32  ;;  %v323_v50 = vadd.f32 %v322_v38, %v239_v31  ;;  %v241_v52 = vmul.f32 %v177_v43, %v177_v43 }
  0x65   :  { %692 = vmatpush1.bf16.msra.mxu0 %v691_v40  ;;  %v301_v51 = vadd.f32 %v300_v34, %v234_v42  ;;  %v245_v53 = vmul.f32 %v181_v41, %v181_v41  ;;  %v693_v58 = vpack.c.bf16 %v181_v41, %v177_v43  ;;  %v243_v60 = vmul.f32 %v179_v48, %v179_v48 }
  0x66   :  { %v260_v56 = vadd.f32 %v259_v45, %v236_v39  ;;  %724 = vmatpush1.bf16.msra.mxu1 %v723_v47  ;;  %v247_v61 = vmul.f32 %v183_v49, %v183_v49  ;;  %v282_v1 = vadd.f32 %v281_v44, %v241_v52  ;;  %v725_v2 = vpack.c.bf16 %v183_v49, %v179_v48 }
  0x67   :  { %v302_v0 = vadd.f32 %v301_v51, %v238_v46  ;;  %v240_v3 = vmul.f32 %v176_v54, %v176_v54  ;;  %694 = vmatprep.subr.bf16.mxu0 %v693_v58  ;;  %v324_v4 = vadd.f32 %v323_v50, %v243_v60  ;;  %v244_v5 = vmul.f32 %v180_v55, %v180_v55 }
  0x68   :  { %v695_v6 = vpack.c.bf16 %v180_v55, %v176_v54  ;;  %v242_v7 = vmul.f32 %v178_v62, %v178_v62  ;;  %v283_v8 = vadd.f32 %v282_v1, %v245_v53  ;;  %726 = vmatprep.subr.bf16.mxu1 %v725_v2  ;;  %v246_v10 = vmul.f32 %v182_v63, %v182_v63 }
  0x69   :  { %v261_v9 = vadd.f32 %v260_v56, %v240_v3  ;;  %v727_v11 = vpack.c.bf16 %v182_v63, %v178_v62  ;;  %v325_v12 = vadd.f32 %v324_v4, %v247_v61  ;;  %v875_v15 = vmov 0.0  }
  0x6a   :  { %696 = vmatpush1.bf16.msra.mxu0 %v695_v6  ;;  %v303_v13 = vadd.f32 %v302_v0, %v242_v7  ;;  %400 = vmatprep.mubr.f32.mxu0 %v875_v15 }
  0x6b   :  { %v262_v14 = vadd.f32 %v261_v9, %v244_v5  ;;  %728 = vmatpush1.bf16.msra.mxu1 %v727_v11  ;;  %471 = vmatprep.mubr.f32.mxu1 %v875_v15 }
  0x6c   :  { %v304_v16 = vadd.f32 %v303_v13, %v246_v10 }
  0xe7   :  { %v105_v17 = vpop.xlane.xlu0 %104 }
  0xe8   :  { %v106_v18 = vmax.f32 %v105_v17, 1e-24 }
  0xea   :  { %740 = vrsqrt.f32 %v106_v18 }
  0xf4   :  { %v741_v19 = vpop.eup %740 }
  0xf5   :  { %v109_v20 = vrot.slane %v741_v19, 1  ;;  %v112_v22 = vmul.f32 %v741_v19, %v931_v57 }
  0xf7   :  { %v113_v21 = vmul.f32 %v109_v20, %v933_v59 }
  0xf9   :  { %v116_v23 = vrot.slane %v113_v21, 7 }
  0xfb   :  { %v117_v24 = vsel %vm99_vm0, %v116_v23, %v112_v22 }
  0xfc   :  { %401 = vmatmul.mubr.f32.vlgmr.msra.gmra.mrb[0].mxu0 %v117_v24  ;;  %119 = vst [vmem:[#allocation9] sm:$0x3] %v117_v24  ;;  %472 = vmatmul.mubr.f32.vlgmr.msra.gmra.mrb[0].mxu1 %v117_v24 }
  0xfd   :  { %825 = shalt.err (!%p822_p11)
}
  0xfe   :  { %s826_s23 = scalar_lea.hbm %s1121_s3, 32 }
  0xff   :  { %p827_p12 = scmp.ne.s32.totalorder %s1121_s3, %s826_s23  ;;  %p830_p13 = scmp.lt.u32.totalorder %s826_s23, %s1121_s3 }
 0x101   :  { %p832_p0 = pnand %p830_p13, %p827_p12 }
 0x103   :  { %835 = shalt.err (!%p832_p0)
}
 0x104   :  { %631 = dma.vmem_to_hbm [thread:$0]  %s629_s20, 32, %s1121_s3, [#allocation6]   ;;  %v263_v57 = vrot.slane %v262_v14, 4  ;;  %v305_v59 = vrot.slane %v304_v16, 4  ;;  %v284_v25 = vrot.slane %v283_v8, 4  ;;  %v326_v26 = vrot.slane %v325_v12, 4 }
 0x105   :  { %v558_v5 = vlaneseq  ;;  %s566_s3 = sld [smem:[#allocation3]]  ;;  %s664_s30 = sld [smem:[#allocation3 + $0x1]]  ;;  %v877_v23 = vmov 1983009808  }
 0x106   :  { %v264_v27 = vadd.f32 %v263_v57, %v262_v14  ;;  %v306_v28 = vadd.f32 %v305_v59, %v304_v16  ;;  %v285_v29 = vadd.f32 %v284_v25, %v283_v8  ;;  %v327_v30 = vadd.f32 %v326_v26, %v325_v12  ;;  %s878_s5 = smov [#allocation10]  }
 0x107   :  { %v559_v11 = vand.u32 127, %v558_v5  ;;  %v974_v15 = vshrl.u32 %v558_v5, 7  ;;  %v992_v24 = vunpack.c.l.s4 %v877_v23  ;;  %s638_s6 = sshll.u32 %s878_s5, 4  ;;  %s639_s6 = int_to_ptr.vmem [resolvable:$true] %s638_s6 }
 0x108   :  { %v265_v31 = vrot.slane %v264_v27, 2  ;;  %v307_v32 = vrot.slane %v306_v28, 2  ;;  %v286_v33 = vrot.slane %v285_v29, 2  ;;  %v328_v34 = vrot.slane %v327_v30, 2  ;;  %s836_s7 = scalar_lea.vmem %s639_s6, 128  ;;  %p841_p2 = scmp.lt.s32.totalorder %s639_s6, %s639_s6 }
 0x109   :  { %v561_v14 = vadd.s32 256, %v559_v11  ;;  %v560_v17 = vadd.s32 128, %v559_v11  ;;  %v978_v18 = vadd.s32 384, %v559_v11  ;;  %vm565_vm2 = vcmp.eq.s32.totalorder %v974_v15, 0  ;;  %p837_p1 = scmp.ne.s32.totalorder %s639_s6, %s836_s7  ;;  %p842_p3 = scmp.lt.s32.totalorder %s836_s7, %s836_s7 }
 0x10a   :  { %v266_v35 = vadd.f32 %v265_v31, %v264_v27  ;;  %v308_v36 = vadd.f32 %v307_v32, %v306_v28  ;;  %v287_v37 = vadd.f32 %v286_v33, %v285_v29  ;;  %v329_v38 = vadd.f32 %v328_v34, %v327_v30 }
 0x10b   :  { %v567_v19 = vstv %s566_s3  ;;  %v980_v20 = vstv %s664_s30  ;;  %vm576_vm5 = vcmp.eq.s32.totalorder %v974_v15, 1  ;;  %p843_p4 = por %p842_p3, %p841_p2 }
 0x10c   :  { %v267_v39 = vrot.slane %v266_v35, 1  ;;  %v309_v40 = vrot.slane %v308_v36, 1  ;;  %v288_v42 = vrot.slane %v287_v37, 1  ;;  %v330_v43 = vrot.slane %v329_v38, 1 }
 0x10d   :  { %vm568_vm3 = vcmp.eq.s32.totalorder %v559_v11, %v567_v19  ;;  %vm570_vm4 = vcmp.eq.s32.totalorder %v561_v14, %v567_v19  ;;  %vm569_vm6 = vcmp.eq.s32.totalorder %v560_v17, %v567_v19  ;;  %vm571_vm7 = vcmp.eq.s32.totalorder %v978_v18, %v567_v19  ;;  %p844_p5 = pnand %p843_p4, %p837_p1 }
 0x10e   :  { %v268_v41 = vadd.f32 %v267_v39, %v266_v35  ;;  %v310_v44 = vadd.f32 %v309_v40, %v308_v36  ;;  %v289_v45 = vadd.f32 %v288_v42, %v287_v37  ;;  %v331_v46 = vadd.f32 %v330_v43, %v329_v38  ;;  %vm1000_vm12 = vmand %vm565_vm2, %vm568_vm3 }
 0x10f   :  { %vm579_vm8 = vcmp.eq.s32.totalorder %v559_v11, %v980_v20  ;;  %vm580_vm9 = vcmp.eq.s32.totalorder %v560_v17, %v980_v20  ;;  %vm581_vm10 = vcmp.eq.s32.totalorder %v561_v14, %v980_v20  ;;  %vm582_vm11 = vcmp.eq.s32.totalorder %v978_v18, %v980_v20  ;;  %vm1008_vm14 = vmand %vm565_vm2, %vm569_vm6 }
 0x110   :  { %742 = vrsqrt.f32 %v268_v41  ;;  %vm1015_vm1 = vmand %vm565_vm2, %vm570_vm4 }
 0x111   :  { %744 = vrsqrt.f32 %v310_v44  ;;  %vm1024_vm6 = vmand %vm576_vm5, %vm579_vm8 }
 0x112   :  { %746 = vrsqrt.f32 %v289_v45  ;;  %vm1033_vm4 = vmand %vm565_vm2, %vm571_vm7 }
 0x113   :  { %748 = vrsqrt.f32 %v331_v46  ;;  %vm1044_vm8 = vmand %vm576_vm5, %vm581_vm10 }
 0x114   :  { %vm1060_vm10 = vmand %vm576_vm5, %vm580_vm9 }
 0x11a   :  { %v743_v47 = vpop.eup %742 }
 0x11b   :  { %v745_v48 = vpop.eup %744 }
 0x11c   :  { %v747_v49 = vpop.eup %746 }
 0x11d   :  { %v749_v50 = vpop.eup %748 }
 0x1cf   :  { %v402_v51 = vpop.f32.mrb[0].mxu0  ;;  %v473_v52 = vpop.f32.mrb[0].mxu1 }
 0x1d0   :  { %v478_v53 = vmul.f32 %v743_v47, %v402_v51  ;;  %v480_v54 = vmul.f32 %v745_v48, %v473_v52  ;;  %v404_v55 = vpop.f32.mrb[1].mxu0  ;;  %v475_v56 = vpop.f32.mrb[1].mxu1 }
 0x1d1   :  { %v479_v58 = vmul.f32 %v747_v49, %v404_v55  ;;  %v481_v60 = vmul.f32 %v749_v50, %v475_v56 }
 0x1d2   :  { %v955_v61 = vclamps-f32 %v478_v53, 1.0  ;;  %v957_v62 = vclamps-f32 %v480_v54, 1.0 }
 0x1d3   :  { %v959_v63 = vclamps-f32 %v479_v58, 1.0  ;;  %v963_v1 = vclamps-f32 %v481_v60, 1.0 }
 0x1d4   :  { %v490_v0 = vmul.f32 %v955_v61, %v955_v61  ;;  %v492_v2 = vmul.f32 %v957_v62, %v957_v62  ;;  %v530_v22 = vmul.f32 0.87758255, %v955_v61  ;;  %v656_v25 = vadd.f32 0.87758255, %v955_v61 }
 0x1d5   :  { %v491_v4 = vmul.f32 %v959_v63, %v959_v63  ;;  %v493_v9 = vmul.f32 %v963_v1, %v963_v1  ;;  %v660_v26 = vadd.f32 -0.23971277, %v955_v61  ;;  %v532_v27 = vmul.f32 0.87758255, %v957_v62 }
 0x1d6   :  { %v494_v3 = vsub.f32 1.0, %v490_v0  ;;  %v496_v6 = vsub.f32 1.0, %v492_v2  ;;  %v658_v31 = vadd.f32 0.87758255, %v957_v62  ;;  %v662_v39 = vadd.f32 -0.23971277, %v957_v62 }
 0x1d7   :  { %v495_v8 = vsub.f32 1.0, %v491_v4  ;;  %v497_v13 = vsub.f32 1.0, %v493_v9  ;;  %v531_v47 = vmul.f32 0.87758255, %v959_v63  ;;  %v657_v54 = vadd.f32 0.87758255, %v959_v63 }
 0x1d8   :  { %v498_v7 = vmax.f32 %v494_v3, 0.0  ;;  %v500_v10 = vmax.f32 %v496_v6, 0.0  ;;  %vm548_vm2 = vcmp.le.f32.partialorder %v658_v31, 0.0  ;;  %v659_v9 = vadd.f32 0.87758255, %v963_v1 }
 0x1d9   :  { %v971_v12 = vmax.f32 %v495_v8, 0.0  ;;  %v976_v16 = vmax.f32 %v497_v13, 0.0  ;;  %v663_v17 = vadd.f32 -0.23971277, %v963_v1 }
 0x1da   :  { %750 = vrsqrt.f32 %v498_v7  ;;  %vm504_vm13 = vcmp.eq.f32.partialorder %v498_v7, inf  ;;  %v507_v29 = vand.u32 2147483648, %v498_v7  ;;  %vm506_vm15 = vcmp.eq.f32.partialorder %v498_v7, 0.0 }
 0x1db   :  { %752 = vrsqrt.f32 %v500_v10  ;;  %vm518_vm0 = vcmp.eq.f32.partialorder %v500_v10, inf  ;;  %v521_v34 = vand.u32 2147483648, %v500_v10  ;;  %vm520_vm3 = vcmp.eq.f32.partialorder %v500_v10, 0.0 }
 0x1dc   :  { %754 = vrsqrt.f32 %v971_v12  ;;  %v514_v46 = vand.u32 2147483648, %v971_v12  ;;  %vm513_vm7 = vcmp.eq.f32.partialorder %v971_v12, 0.0  ;;  %v528_v60 = vand.u32 2147483648, %v976_v16 }
 0x1dd   :  { %756 = vrsqrt.f32 %v976_v16  ;;  %vm527_vm9 = vcmp.eq.f32.partialorder %v976_v16, 0.0 }
 0x1e4   :  { %v751_v21 = vpop.eup %750 }
 0x1e5   :  { %v753_v57 = vpop.eup %752  ;;  %v503_v59 = vmul.f32 %v751_v21, %v498_v7 }
 0x1e6   :  { %v517_v30 = vmul.f32 %v753_v57, %v500_v10  ;;  %v755_v36 = vpop.eup %754 }
 0x1e7   :  { %v505_v33 = vsel %vm504_vm13, %v498_v7, %v503_v59  ;;  %vm546_vm13 = vcmp.le.f32.partialorder %v656_v25, 0.0  ;;  %v510_v41 = vmul.f32 %v755_v36, %v971_v12  ;;  %v757_v49 = vpop.eup %756  ;;  %v661_v7 = vadd.f32 -0.23971277, %v959_v63 }
 0x1e8   :  { %v508_v37 = vsel %vm506_vm15, %v507_v29, %v505_v33  ;;  %v519_v38 = vsel %vm518_vm0, %v500_v10, %v517_v30  ;;  %vm511_vm15 = vcmp.eq.f32.partialorder %v971_v12, inf  ;;  %vm587_vm0 = vmor %vm1000_vm12, %vm1024_vm6  ;;  %v524_v55 = vmul.f32 %v757_v49, %v976_v16 }
 0x1e9   :  { %v534_v42 = vmul.f32 0.47942555, %v508_v37  ;;  %v522_v43 = vsel %vm520_vm3, %v521_v34, %v519_v38  ;;  %v512_v51 = vsel %vm511_vm15, %v971_v12, %v510_v41  ;;  %vm525_vm3 = vcmp.eq.f32.partialorder %v976_v16, inf  ;;  %vm1072_vm15 = vmand %vm576_vm5, %vm582_vm11 }
 0x1ea   :  { %v536_v45 = vmul.f32 0.47942555, %v522_v43  ;;  %v515_v53 = vsel %vm513_vm7, %v514_v46, %v512_v51  ;;  %v526_v3 = vsel %vm525_vm3, %v976_v16, %v524_v55  ;;  %vm588_vm5 = vmor %vm1008_vm14, %vm1060_vm10  ;;  %vm547_vm11 = vcmp.le.f32.partialorder %v657_v54, 0.0 }
 0x1eb   :  { %v538_v50 = vsub.f32 %v530_v22, %v534_v42  ;;  %v535_v58 = vmul.f32 0.47942555, %v515_v53  ;;  %v529_v8 = vsel %vm527_vm9, %v528_v60, %v526_v3  ;;  %v533_v10 = vmul.f32 0.87758255, %v963_v1  ;;  %vm590_vm12 = vmor %vm1033_vm4, %vm1072_vm15 }
 0x1ec   :  { %v540_v52 = vsub.f32 %v532_v27, %v536_v45  ;;  %v537_v11 = vmul.f32 0.47942555, %v529_v8  ;;  %v607_v12 = vunpack.c.0.s8 %v992_v24  ;;  %vm549_vm14 = vcmp.le.f32.partialorder %v659_v9, 0.0 }
 0x1ed   :  { %v554_v0 = vsel %vm546_vm13, %v660_v26, %v538_v50  ;;  %vm589_vm13 = vmor %vm1015_vm1, %vm1044_vm8  ;;  %v539_v6 = vsub.f32 %v531_v47, %v535_v58 }
 0x1ee   :  { %v556_v4 = vsel %vm548_vm2, %v662_v39, %v540_v52  ;;  %v591_v5 = vsel %vm587_vm0, %v554_v0, %v955_v61  ;;  %v541_v16 = vsub.f32 %v533_v10, %v537_v11  ;;  %v610_v22 = vsub.s32 %v607_v12, %v974_v15 }
 0x1ef   :  { %v555_v13 = vsel %vm547_vm11, %v661_v7, %v539_v6  ;;  %v593_v61 = vsel %vm589_vm13, %v556_v4, %v957_v62  ;;  %v595_v14 = vmul.f32 64.0, %v591_v5 }
 0x1f0   :  { %v592_v18 = vsel %vm588_vm5, %v555_v13, %v959_v63  ;;  %v557_v20 = vsel %vm549_vm14, %v663_v17, %v541_v16  ;;  %v597_v21 = vmul.f32 64.0, %v593_v61 }
 0x1f1   :  { %v596_v19 = vmul.f32 64.0, %v592_v18  ;;  %v594_v23 = vsel %vm590_vm12, %v557_v20, %v963_v1 }
 0x1f2   :  { %v598_v24 = vmul.f32 64.0, %v594_v23 }
 0x1f3   :  { %v603_v62 = vcombine.low %v595_v14, %v596_v19 }
 0x1f4   :  { %v604_v57 = vcombine.low %v597_v21, %v598_v24 }
 0x1f5   :  { %v611_v59 = vrot.slane %v603_v62, %v610_v22 }
 0x1f6   :  { %v618_v25 = vrot.slane %v604_v57, %v610_v22 }
 0x1f8   :  { %v619_v26 = vcombine.low %v611_v59, %v618_v25 }
 0x1fa   :  { %621 = vst [vmem:[#allocation10] sm:$0xff] %v619_v26 }
 0x1fb   :  { %847 = shalt.err (!%p844_p5)
}
 0x1fc   :  { %s848_s10 = scalar_lea.hbm %s1122_s4, 128 }
 0x1fd   :  { %p849_p6 = scmp.ne.s32.totalorder %s1122_s4, %s848_s10  ;;  %p852_p7 = scmp.lt.u32.totalorder %s848_s10, %s1122_s4 }
 0x1ff   :  { %p854_p8 = pnand %p852_p7, %p849_p6 }
 0x201   :  { %857 = shalt.err (!%p854_p8)
}
 0x202   :  { %641 = dma.vmem_to_hbm [thread:$0]  %s639_s6, 128, %s1122_s4, [#allocation11]  }
 0x203   :  { %864 = dma.done.wait [#allocation6], 32  }
 0x204   :  { %865 = vsyncadd [#allocation6], 4294967264 }
 0x205   :  { %866 = dma.done.wait [#allocation11], 128  }
 0x206   :  { %867 = vsyncadd [#allocation11], 4294967168 }
 0x207   :  { %648 = vsyncpa [#allocation5], 1 }
 0x208   :  { %649 = vsyncpa [#allocation8], 1 }
 0x209   :  { %650 = vsyncpa [#allocation6], 1 }
 0x20a   :  { %651 = vsyncpa [#allocation11], 1 }

// kernel: segverid_forward_with_arcmargin.2
= control target key start
LH: loop header
LB: loop body
LE: loop exit
PB: predicated region body
PF: predicated region fallthrough
CT: control target
= control target key end

     0   :  { %s5782_s12 = smov 0   ;;  %s6996_s0 = inlined_call_operand.vmem [shape: f32[2,18,18,64], index: 0, kind: input, shape index: {}]   ;;  %s6997_s1 = inlined_call_operand.vmem [shape: f32[9,64,128], index: 1, kind: input, shape index: {}]   ;;  %s6998_s2 = inlined_call_operand.vmem [shape: f32[1,128], index: 2, kind: input, shape index: {}]   ;;  %s6999_s3 = inlined_call_operand.vmem [shape: f32[2,256,128], index: 3, kind: output, shape index: {}]  }
   0x1 LB: > { %s3813_s13 = sadd.s32 4294967295, %s5760_s12   ;;  %p3817_p0 = scmp.ge.s32.totalorder %s5760_s12, 1  ;;  %s5760_s12 = sphi %s5782_s12, %s13_s12  }
   0x2   : > { %p137_p1 = scmp.lt.s32.totalorder %s5760_s12, 3 }
   0x4   : > { %p138_p2 = pnand %p3817_p0, %p137_p1 }
   0x6   : > { %141 = sbr.rel (%p138_p2) target bundleno = 534 (0x216), region = 32 }
   0xd   : > { %v210_v0 = vld [vmem:[%s6997_s1] sm:$0xff]  ;;  %v211_v1 = vld [vmem:[%s6997_s1 + $0x8] sm:$0xff]  ;;  %p161_p3 = scmp.lt.s32.totalorder %s3813_s13, 1  ;;  %v212_v5 = vld [vmem:[%s6997_s1 + $0x10] sm:$0xff]  ;;  %vm218_vm0 = vcmask 523264  }
   0xe   : > { %v4038_v2 = vld [vmem:[%s6997_s1 + $0x100] sm:$0xff]  ;;  %v5305_v3 = vpack.c.bf16 %v211_v1, %v210_v0  ;;  %v4039_v4 = vld [vmem:[%s6997_s1 + $0x108] sm:$0xff]  ;;  %v213_v6 = vld [vmem:[%s6997_s1 + $0x18] sm:$0xff] }
   0xf   : > { %v5808_v7 = vpack.c.bf16 %v4039_v4, %v4038_v2  ;;  %v5309_v8 = vpack.c.bf16 %v213_v6, %v212_v5  ;;  %v4040_v9 = vld [vmem:[%s6997_s1 + $0x110] sm:$0xff]  ;;  %v4041_v10 = vld [vmem:[%s6997_s1 + $0x118] sm:$0xff]  ;;  %v214_v11 = vld [vmem:[%s6997_s1 + $0x20] sm:$0xff]  ;;  %s7152_s13 = smov (!%p161_p3, %s3813_s13), 1 }
  0x10   : > { %5306 = vmatprep.subr.bf16.mxu1 %v5305_v3  ;;  %v5821_v12 = vpack.c.bf16 %v4041_v10, %v4040_v9  ;;  %v215_v13 = vld [vmem:[%s6997_s1 + $0x28] sm:$0xff]  ;;  %v4042_v14 = vld [vmem:[%s6997_s1 + $0x120] sm:$0xff]  ;;  %s5745_s11 = smul.u32 432, %s7152_s13  ;;  %v216_v18 = vld [vmem:[%s6997_s1 + $0x30] sm:$0xff]  ;;  %s4368_s17 = sshll.u32 %s7152_s13, 8 }
  0x11   : > { %v4043_v15 = vld [vmem:[%s6997_s1 + $0x128] sm:$0xff]  ;;  %5370 = vmatprep.subr.bf16.mxu0 %v5808_v7  ;;  %5308 = vmatpush3.bf16.msra.mxu1 %v5305_v3  ;;  %v5313_v16 = vpack.c.bf16 %v215_v13, %v214_v11  ;;  %v217_v19 = vld [vmem:[%s6997_s1 + $0x38] sm:$0xff]  ;;  %v4044_v20 = vld [vmem:[%s6997_s1 + $0x130] sm:$0xff]  ;;  %s6929_s20 = scalar_lea.vmem %s6999_s3, %s4368_s17 }
  0x12   : > { %7064 = vst [vmem:[#allocation2_spill] sm:$0xff] %v5821_v12  ;;  %5372 = vmatpush3.bf16.msra.mxu0 %v5808_v7  ;;  %5310 = vmatprep.subr.bf16.mxu1 %v5309_v8  ;;  %v5836_v17 = vpack.c.bf16 %v4043_v15, %v4042_v14  ;;  %s5850_s22 = scalar_lea.vmem %s6996_s0, %s5745_s11  ;;  %v4045_v21 = vld [vmem:[%s6997_s1 + $0x138] sm:$0xff]  ;;  %v5317_v24 = vpack.c.bf16 %v217_v19, %v216_v18  ;;  %v3854_v26 = vld [vmem:[%s6997_s1 + $0x40] sm:$0xff]  ;;  %v3855_v27 = vld [vmem:[%s6997_s1 + $0x48] sm:$0xff] }
  0x13   : > { %5374 = vmatprep.subr.bf16.mxu0 %v5821_v12  ;;  %v178_v22 = vld [vmem:[%s5850_s22] sm:$0xff]  ;;  %v5862_v25 = vpack.c.bf16 %v4045_v21, %v4044_v20  ;;  %v4111_v29 = vld [vmem:[%s6997_s1 + $0x148] sm:$0xff]  ;;  %v5321_v30 = vpack.c.bf16 %v3855_v27, %v3854_v26  ;;  %v3856_v32 = vld [vmem:[%s6997_s1 + $0x50] sm:$0xff] }
  0x14   : > { %7065 = vst [vmem:[#allocation3_spill] sm:$0xff] %v5836_v17  ;;  %v5857_v23 = vld [vmem:[%s5850_s22 + $0x19] sm:$0xff]  ;;  %4745 = vmatprep.mubr.msk.f32.mxu1 %vm218_vm0, %v178_v22  ;;  %v179_v34 = vld [vmem:[%s5850_s22 + $0x8] sm:$0xff]  ;;  %v4112_v35 = vld [vmem:[%s6997_s1 + $0x150] sm:$0xff] }
  0x15   : > { %5312 = vmatpush3.bf16.msra.mxu1 %v5309_v8  ;;  %7066 = vst [vmem:[#allocation4_spill] sm:$0xff] %v5862_v25  ;;  %5001 = vmatprep.mubr.msk.f32.mxu0 %vm218_vm0, %v5857_v23  ;;  %v4110_v28 = vld [vmem:[%s6997_s1 + $0x140] sm:$0xff]  ;;  %v3857_v33 = vld [vmem:[%s6997_s1 + $0x58] sm:$0xff]  ;;  %v4115_v45 = vld [vmem:[%s6997_s1 + $0x168] sm:$0xff] }
  0x16   : > { %5376 = vmatpush3.bf16.msra.mxu0 %v5821_v12  ;;  %5314 = vmatprep.subr.bf16.mxu1 %v5313_v16  ;;  %v5385_v31 = vpack.c.bf16 %v4111_v29, %v4110_v28  ;;  %v4113_v36 = vld [vmem:[%s6997_s1 + $0x158] sm:$0xff]  ;;  %v5895_v37 = vld [vmem:[%s5850_s22 + $0x21] sm:$0xff]  ;;  %v5325_v40 = vpack.c.bf16 %v3857_v33, %v3856_v32  ;;  %v5923_v46 = vld [vmem:[%s5850_s22 + $0x30] sm:$0xff] }
  0x17   : > { %5378 = vmatprep.subr.bf16.mxu0 %v5836_v17  ;;  %v5898_v38 = vld [vmem:[%s5850_s22 + $0x18] sm:$0xff]  ;;  %v5905_v41 = vld [vmem:[%s5850_s22 + $0x20] sm:$0xff]  ;;  %v5389_v42 = vpack.c.bf16 %v4113_v36, %v4112_v35  ;;  %7069 = vst [vmem:[#allocation7_spill] sm:$0xff] %v5923_v46  ;;  %v3859_v48 = vld [vmem:[%s6997_s1 + $0x68] sm:$0xff] }
  0x18   : > { %7067 = vst [vmem:[#allocation5_spill] sm:$0xff] %v5898_v38  ;;  %v5901_v39 = vld [vmem:[%s5850_s22 + $0x31] sm:$0xff]  ;;  %7068 = vst [vmem:[#allocation6_spill] sm:$0xff] %v5905_v41  ;;  %v5910_v43 = vld [vmem:[%s5850_s22 + $0x39] sm:$0xff] }
  0x19   : > { %5316 = vmatpush3.bf16.msra.mxu1 %v5313_v16  ;;  %v4114_v44 = vld [vmem:[%s6997_s1 + $0x160] sm:$0xff]  ;;  %v5932_v49 = vld [vmem:[%s5850_s22 + $0x49] sm:$0xff]  ;;  %v5941_v52 = vld [vmem:[%s5850_s22 + $0x38] sm:$0xff] }
  0x1a   : > { %5380 = vmatpush3.bf16.msra.mxu0 %v5836_v17  ;;  %5318 = vmatprep.subr.bf16.mxu1 %v5317_v24  ;;  %v3858_v47 = vld [vmem:[%s6997_s1 + $0x60] sm:$0xff]  ;;  %v5393_v51 = vpack.c.bf16 %v4115_v45, %v4114_v44  ;;  %7070 = vst [vmem:[#allocation8_spill] sm:$0xff] %v5941_v52  ;;  %v4116_v53 = vld [vmem:[%s6997_s1 + $0x170] sm:$0xff]  ;;  %v4117_v54 = vld [vmem:[%s6997_s1 + $0x178] sm:$0xff] }
  0x1b   : > { %5382 = vmatprep.subr.bf16.mxu0 %v5862_v25  ;;  %v5329_v50 = vpack.c.bf16 %v3859_v48, %v3858_v47  ;;  %v5952_v55 = vld [vmem:[%s5850_s22 + $0x51] sm:$0xff]  ;;  %v5955_v56 = vld [vmem:[%s5850_s22 + $0x48] sm:$0xff]  ;;  %v5397_v59 = vpack.c.bf16 %v4117_v54, %v4116_v53  ;;  %v4182_v61 = vld [vmem:[%s6997_s1 + $0x180] sm:$0xff] }
  0x1c   : > { %7071 = vst [vmem:[#allocation9_spill] sm:$0xff] %v5955_v56  ;;  %v5958_v57 = vld [vmem:[%s5850_s22 + $0x61] sm:$0xff]  ;;  %v5963_v58 = vld [vmem:[%s5850_s22 + $0x50] sm:$0xff]  ;;  %v3861_v63 = vld [vmem:[%s6997_s1 + $0x78] sm:$0xff] }
  0x1d   : > { %5320 = vmatpush3.bf16.msra.mxu1 %v5317_v24  ;;  %7072 = vst [vmem:[#allocation10_spill] sm:$0xff] %v5963_v58  ;;  %v3860_v60 = vld [vmem:[%s6997_s1 + $0x70] sm:$0xff]  ;;  %v4183_v62 = vld [vmem:[%s6997_s1 + $0x188] sm:$0xff]  ;;  %v5987_v1 = vld [vmem:[%s5850_s22 + $0x60] sm:$0xff] }
  0x1e   : > { %5384 = vmatpush3.bf16.msra.mxu0 %v5862_v25  ;;  %5322 = vmatprep.subr.bf16.mxu1 %v5321_v30  ;;  %v5984_v0 = vld [vmem:[%s5850_s22 + $0x69] sm:$0xff]  ;;  %v5333_v2 = vpack.c.bf16 %v3861_v63, %v3860_v60  ;;  %v5990_v3 = vld [vmem:[%s5850_s22 + $0x79] sm:$0xff]  ;;  %v5401_v4 = vpack.c.bf16 %v4183_v62, %v4182_v61  ;;  %v6004_v6 = vld [vmem:[%s5850_s22 + $0x81] sm:$0xff] }
  0x1f   : > { %5386 = vmatprep.subr.bf16.mxu0 %v5385_v31  ;;  %v5999_v5 = vld [vmem:[%s5850_s22 + $0x68] sm:$0xff]  ;;  %v6007_v8 = vld [vmem:[%s5850_s22 + $0x78] sm:$0xff]  ;;  %v3894_v10 = vld [vmem:[%s6997_s1 + $0x80] sm:$0xff] }
  0x20   : > { %4746 = vmatmul.mubr.msk.f32.vlgmr.msra.gmra.mrb[0].mxu1 %vm218_vm0, %v179_v34  ;;  %7073 = vst [vmem:[#allocation11_spill] sm:$0xff] %v5999_v5  ;;  %v6010_v9 = vld [vmem:[%s5850_s22 + $0x91] sm:$0xff]  ;;  %v3895_v11 = vld [vmem:[%s6997_s1 + $0x88] sm:$0xff]  ;;  %v6027_v14 = vld [vmem:[%s5850_s22 + $0x80] sm:$0xff] }
  0x21   : > { %5002 = vmatmul.mubr.msk.f32.vlgmr.msra.gmra.mrb[0].mxu0 %vm218_vm0, %v5895_v37  ;;  %5324 = vmatpush3.bf16.msra.mxu1 %v5321_v30  ;;  %v6020_v13 = vpack.c.bf16 %v3895_v11, %v3894_v10  ;;  %v6032_v15 = vld [vmem:[%s5850_s22 + $0x99] sm:$0xff]  ;;  %v6035_v16 = vld [vmem:[%s5850_s22 + $0x90] sm:$0xff]  ;;  %v6056_v21 = vld [vmem:[%s5850_s22 + $0xa8] sm:$0xff] }
  0x22   : > { %4748 = vmatprep.mubr.msk.f32.mxu1 %vm218_vm0, %v5898_v38  ;;  %5004 = vmatprep.mubr.msk.f32.mxu0 %vm218_vm0, %v5901_v39  ;;  %7074 = vst [vmem:[#allocation12_spill] sm:$0xff] %v6035_v16  ;;  %v6039_v18 = vld [vmem:[%s5850_s22 + $0xa9] sm:$0xff]  ;;  %v6048_v19 = vld [vmem:[%s5850_s22 + $0x98] sm:$0xff]  ;;  %7077 = vst [vmem:[#allocation15_spill] sm:$0xff] %v6056_v21 }
  0x23   : > { %5388 = vmatpush3.bf16.msra.mxu0 %v5385_v31  ;;  %5326 = vmatprep.subr.bf16.mxu1 %v5325_v40  ;;  %7075 = vst [vmem:[#allocation13_spill] sm:$0xff] %v6048_v19  ;;  %v6053_v20 = vld [vmem:[%s5850_s22 + $0xb1] sm:$0xff]  ;;  %v6059_v22 = vld [vmem:[%s5850_s22 + $0xc1] sm:$0xff]  ;;  %v6073_v26 = vld [vmem:[%s5850_s22 + $0xc9] sm:$0xff] }
  0x24   : > { %4749 = vmatmul.mubr.msk.f32.gmra.mrb[2].mxu1 %vm218_vm0, %v5905_v41  ;;  %5390 = vmatprep.subr.bf16.mxu0 %v5389_v42  ;;  %7076 = vst [vmem:[#allocation14_spill] sm:$0xff] %v6053_v20  ;;  %v6068_v24 = vld [vmem:[%s5850_s22 + $0xb0] sm:$0xff]  ;;  %v6076_v27 = vld [vmem:[%s5850_s22 + $0xc0] sm:$0xff]  ;;  %v4185_v30 = vld [vmem:[%s6997_s1 + $0x198] sm:$0xff] }
  0x25   : > { %5005 = vmatmul.mubr.msk.f32.gmra.mrb[2].mxu0 %vm218_vm0, %v5910_v43  ;;  %4751 = vmatprep.mubr.msk.f32.mxu1 %vm218_vm0, %v5923_v46  ;;  %7078 = vst [vmem:[#allocation16_spill] sm:$0xff] %v6068_v24  ;;  %7079 = vst [vmem:[#allocation17_spill] sm:$0xff] %v6076_v27  ;;  %v6079_v28 = vld [vmem:[%s5850_s22 + $0x1a] sm:$0xff]  ;;  %v4184_v29 = vld [vmem:[%s6997_s1 + $0x190] sm:$0xff] }
  0x26   : > { %5007 = vmatprep.mubr.msk.f32.mxu0 %vm218_vm0, %v5932_v49  ;;  %5328 = vmatpush3.bf16.msra.mxu1 %v5325_v40  ;;  %v6094_v31 = vld [vmem:[%s5850_s22 + $0xc8] sm:$0xff]  ;;  %v6102_v33 = vld [vmem:[%s5850_s22 + $0xd8] sm:$0xff]  ;;  %v5405_v35 = vpack.c.bf16 %v4185_v30, %v4184_v29  ;;  %v4186_v36 = vld [vmem:[%s6997_s1 + $0x1a0] sm:$0xff] }
  0x27   : > { %5392 = vmatpush3.bf16.msra.mxu0 %v5389_v42  ;;  %5330 = vmatprep.subr.bf16.mxu1 %v5329_v50  ;;  %7080 = vst [vmem:[#allocation18_spill] sm:$0xff] %v6094_v31  ;;  %v6099_v32 = vld [vmem:[%s5850_s22 + $0x22] sm:$0xff]  ;;  %7081 = vst [vmem:[#allocation19_spill] sm:$0xff] %v6102_v33  ;;  %v6105_v34 = vld [vmem:[%s5850_s22 + $0x32] sm:$0xff] }
  0x28   : > { %4752 = vmatmul.mubr.msk.f32.gmra.mrb[4].mxu1 %vm218_vm0, %v5941_v52  ;;  %5394 = vmatprep.subr.bf16.mxu0 %v5393_v51  ;;  %v4187_v40 = vld [vmem:[%s6997_s1 + $0x1a8] sm:$0xff]  ;;  %v6120_v42 = vld [vmem:[%s5850_s22 + $0xe0] sm:$0xff]  ;;  %v6128_v45 = vld [vmem:[%s5850_s22 + $0xf0] sm:$0xff] }
  0x29   : > { %5008 = vmatmul.mubr.msk.f32.gmra.mrb[4].mxu0 %vm218_vm0, %v5952_v55  ;;  %4754 = vmatprep.mubr.msk.f32.mxu1 %vm218_vm0, %v5955_v56  ;;  %v6125_v44 = vld [vmem:[%s5850_s22 + $0x3a] sm:$0xff]  ;;  %v6131_v47 = vld [vmem:[%s5850_s22 + $0x4a] sm:$0xff]  ;;  %v5409_v48 = vpack.c.bf16 %v4187_v40, %v4186_v36  ;;  %v6151_v54 = vld [vmem:[%s5850_s22 + $0x52] sm:$0xff] }
  0x2a   : > { %5010 = vmatprep.mubr.msk.f32.mxu0 %vm218_vm0, %v5958_v57  ;;  %5332 = vmatpush3.bf16.msra.mxu1 %v5329_v50  ;;  %v4188_v50 = vld [vmem:[%s6997_s1 + $0x1b0] sm:$0xff]  ;;  %v6146_v53 = vld [vmem:[%s5850_s22 + $0xf8] sm:$0xff]  ;;  %v6157_v60 = vld [vmem:[%s5850_s22 + $0x62] sm:$0xff] }
  0x2b   : > { %5396 = vmatpush3.bf16.msra.mxu0 %v5393_v51  ;;  %5334 = vmatprep.subr.bf16.mxu1 %v5333_v2  ;;  %v4189_v51 = vld [vmem:[%s6997_s1 + $0x1b8] sm:$0xff]  ;;  %v4254_v62 = vld [vmem:[%s6997_s1 + $0x1c0] sm:$0xff]  ;;  %v4255_v63 = vld [vmem:[%s6997_s1 + $0x1c8] sm:$0xff] }
  0x2c   : > { %4755 = vmatmul.mubr.msk.f32.gmra.mrb[6].mxu1 %vm218_vm0, %v5963_v58  ;;  %5398 = vmatprep.subr.bf16.mxu0 %v5397_v59  ;;  %v5413_v61 = vpack.c.bf16 %v4189_v51, %v4188_v50  ;;  %v6180_v10 = vld [vmem:[%s5850_s22 + $0x120] sm:$0xff]  ;;  %v6185_v29 = vpack.c.bf16 %v4255_v63, %v4254_v62  ;;  %v6194_v30 = vld [vmem:[%s5850_s22 + $0x128] sm:$0xff]  ;;  %v6202_v36 = vld [vmem:[%s5850_s22 + $0x138] sm:$0xff] }
  0x2d   : > { %5011 = vmatmul.mubr.msk.f32.gmra.mrb[6].mxu0 %vm218_vm0, %v5984_v0  ;;  %4757 = vmatprep.mubr.msk.f32.mxu1 %vm218_vm0, %v5987_v1  ;;  %v6183_v11 = vld [vmem:[%s5850_s22 + $0x7a] sm:$0xff]  ;;  %v6205_v40 = vld [vmem:[%s5850_s22 + $0x92] sm:$0xff]  ;;  %v6243_v25 = vld [vmem:[%s5850_s22 + $0x168] sm:$0xff] }
  0x2e   : > { %5013 = vmatprep.mubr.msk.f32.mxu0 %vm218_vm0, %v5990_v3  ;;  %5336 = vmatpush3.bf16.msra.mxu1 %v5333_v2  ;;  %v6172_v2 = vld [vmem:[%s5850_s22 + $0x110] sm:$0xff]  ;;  %7083 = vst [vmem:[#allocation21_spill] sm:$0xff] %v6205_v40  ;;  %v6220_v50 = vld [vmem:[%s5850_s22 + $0x9a] sm:$0xff]  ;;  %7088 = vst [vmem:[#allocation26_spill] sm:$0xff] %v6243_v25 }
  0x2f   : > { %5400 = vmatpush3.bf16.msra.mxu0 %v5397_v59  ;;  %5338 = vmatprep.subr.bf16.mxu1 %v6020_v13  ;;  %v6154_v59 = vld [vmem:[%s5850_s22 + $0x108] sm:$0xff]  ;;  %7084 = vst [vmem:[#allocation22_spill] sm:$0xff] %v6220_v50  ;;  %v6223_v51 = vld [vmem:[%s5850_s22 + $0x150] sm:$0xff]  ;;  %v6235_v62 = vld [vmem:[%s5850_s22 + $0x158] sm:$0xff] }
  0x30   : > { %4758 = vmatmul.mubr.msk.f32.gmra.mrb[8].mxu1 %vm218_vm0, %v5999_v5  ;;  %5402 = vmatprep.subr.bf16.mxu0 %v5401_v4  ;;  %7086 = vst [vmem:[#allocation24_spill] sm:$0xff] %v6235_v62  ;;  %v6240_v63 = vld [vmem:[%s5850_s22 + $0xb2] sm:$0xff]  ;;  %v6246_v17 = vld [vmem:[%s5850_s22 + $0xc2] sm:$0xff]  ;;  %v6260_v41 = vld [vmem:[%s5850_s22 + $0xca] sm:$0xff] }
  0x31   : > { %5014 = vmatmul.mubr.msk.f32.gmra.mrb[8].mxu0 %vm218_vm0, %v6004_v6  ;;  %4760 = vmatprep.mubr.msk.f32.mxu1 %vm218_vm0, %v6007_v8  ;;  %7087 = vst [vmem:[#allocation25_spill] sm:$0xff] %v6240_v63  ;;  %7089 = vst [vmem:[#allocation27_spill] sm:$0xff] %v6246_v17  ;;  %v6255_v12 = vld [vmem:[%s5850_s22 + $0x170] sm:$0xff]  ;;  %v572_v38 = vld [vmem:[%s5850_s22 + $0x1] sm:$0xff] }
  0x32   : > { %5016 = vmatprep.mubr.msk.f32.mxu0 %vm218_vm0, %v6010_v9  ;;  %7090 = vst [vmem:[#allocation28_spill] sm:$0xff] %v6255_v12 }
  0x34   : > { %4761 = vmatmul.mubr.msk.f32.gmra.mrb[10].mxu1 %vm218_vm0, %v6027_v14 }
  0x35   : > { %5017 = vmatmul.mubr.msk.f32.gmra.mrb[10].mxu0 %vm218_vm0, %v6032_v15  ;;  %4763 = vmatprep.mubr.msk.f32.mxu1 %vm218_vm0, %v6035_v16 }
  0x36   : > { %5019 = vmatprep.mubr.msk.f32.mxu0 %vm218_vm0, %v6039_v18 }
  0x38   : > { %4764 = vmatmul.mubr.msk.f32.gmra.mrb[12].mxu1 %vm218_vm0, %v6048_v19 }
  0x39   : > { %5020 = vmatmul.mubr.msk.f32.gmra.mrb[12].mxu0 %vm218_vm0, %v6053_v20  ;;  %4766 = vmatprep.mubr.msk.f32.mxu1 %vm218_vm0, %v6056_v21 }
  0x3a   : > { %5022 = vmatprep.mubr.msk.f32.mxu0 %vm218_vm0, %v6059_v22 }
  0x3c   : > { %4767 = vmatmul.mubr.msk.f32.gmra.mrb[14].mxu1 %vm218_vm0, %v6068_v24 }
  0x3d   : > { %5023 = vmatmul.mubr.msk.f32.gmra.mrb[14].mxu0 %vm218_vm0, %v6073_v26  ;;  %4769 = vmatprep.mubr.msk.f32.mxu1 %vm218_vm0, %v6076_v27 }
  0x3e   : > { %5065 = vmatprep.mubr.msk.f32.mxu0 %vm218_vm0, %v6079_v28 }
  0x40   : > { %4770 = vmatmul.mubr.msk.f32.gmra.mrb[16].mxu1 %vm218_vm0, %v6094_v31 }
  0x41   : > { %5066 = vmatmul.mubr.msk.f32.vlgmr.msra.gmra.mrb[0].mxu0 %vm218_vm0, %v6099_v32  ;;  %4772 = vmatprep.mubr.msk.f32.mxu1 %vm218_vm0, %v6102_v33 }
  0x42   : > { %5068 = vmatprep.mubr.msk.f32.mxu0 %vm218_vm0, %v6105_v34  ;;  %5404 = vmatpush3.bf16.msra.mxu0 %v5401_v4  ;;  %v6177_v4 = vld [vmem:[%s5850_s22 + $0x6a] sm:$0xff] }
  0x43   : > { %5406 = vmatprep.subr.bf16.mxu0 %v5405_v35 }
  0x44   : > { %4773 = vmatmul.mubr.msk.f32.gmra.mrb[18].mxu1 %vm218_vm0, %v6120_v42 }
  0x45   : > { %5069 = vmatmul.mubr.msk.f32.gmra.mrb[2].mxu0 %vm218_vm0, %v6125_v44  ;;  %4775 = vmatprep.mubr.msk.f32.mxu1 %vm218_vm0, %v6128_v45 }
  0x46   : > { %5071 = vmatprep.mubr.msk.f32.mxu0 %vm218_vm0, %v6131_v47  ;;  %5408 = vmatpush3.bf16.msra.mxu0 %v5405_v35  ;;  %v6199_v35 = vld [vmem:[%s5850_s22 + $0x82] sm:$0xff] }
  0x47   : > { %5410 = vmatprep.subr.bf16.mxu0 %v5409_v48  ;;  %7082 = vst [vmem:[#allocation20_spill] sm:$0xff] %v6199_v35 }
  0x48   : > { %4776 = vmatmul.mubr.msk.f32.gmra.mrb[20].mxu1 %vm218_vm0, %v6146_v53 }
  0x49   : > { %5072 = vmatmul.mubr.msk.f32.gmra.mrb[4].mxu0 %vm218_vm0, %v6151_v54  ;;  %4778 = vmatprep.mubr.msk.f32.mxu1 %vm218_vm0, %v6154_v59 }
  0x4a   : > { %5074 = vmatprep.mubr.msk.f32.mxu0 %vm218_vm0, %v6157_v60  ;;  %5412 = vmatpush3.bf16.msra.mxu0 %v5409_v48  ;;  %v6215_v48 = vld [vmem:[%s5850_s22 + $0x140] sm:$0xff] }
  0x4b   : > { %5414 = vmatprep.subr.bf16.mxu0 %v5413_v61 }
  0x4c   : > { %4779 = vmatmul.mubr.msk.f32.gmra.mrb[22].mxu1 %vm218_vm0, %v6172_v2 }
  0x4d   : > { %5075 = vmatmul.mubr.msk.f32.gmra.mrb[6].mxu0 %vm218_vm0, %v6177_v4  ;;  %4781 = vmatprep.mubr.msk.f32.mxu1 %vm218_vm0, %v6180_v10 }
  0x4e   : > { %5077 = vmatprep.mubr.msk.f32.mxu0 %vm218_vm0, %v6183_v11  ;;  %5416 = vmatpush3.bf16.msra.mxu0 %v5413_v61  ;;  %v6226_v61 = vld [vmem:[%s5850_s22 + $0xaa] sm:$0xff] }
  0x4f   : > { %5418 = vmatprep.subr.bf16.mxu0 %v6185_v29  ;;  %7085 = vst [vmem:[#allocation23_spill] sm:$0xff] %v6226_v61 }
  0x50   : > { %4782 = vmatmul.mubr.msk.f32.gmra.mrb[24].mxu1 %vm218_vm0, %v6194_v30 }
  0x51   : > { %5078 = vmatmul.mubr.msk.f32.gmra.mrb[8].mxu0 %vm218_vm0, %v6199_v35  ;;  %4784 = vmatprep.mubr.msk.f32.mxu1 %vm218_vm0, %v6202_v36 }
  0x52   : > { %5080 = vmatprep.mubr.msk.f32.mxu0 %vm218_vm0, %v6205_v40  ;;  %v6281_v40 = vld [vmem:[%s5850_s22 + $0xe2] sm:$0xff] }
  0x53   : > { %7091 = vst [vmem:[#allocation29_spill] sm:$0xff] %v6281_v40 }
  0x54   : > { %4785 = vmatmul.mubr.msk.f32.gmra.mrb[26].mxu1 %vm218_vm0, %v6215_v48 }
  0x55   : > { %5081 = vmatmul.mubr.msk.f32.gmra.mrb[10].mxu0 %vm218_vm0, %v6220_v50  ;;  %4787 = vmatprep.mubr.msk.f32.mxu1 %vm218_vm0, %v6223_v51  ;;  %v3897_v50 = vld [vmem:[%s6997_s1 + $0x98] sm:$0xff] }
  0x56   : > { %5083 = vmatprep.mubr.msk.f32.mxu0 %vm218_vm0, %v6226_v61  ;;  %v6264_v61 = vld [vmem:[%s5850_s22 + $0xda] sm:$0xff] }
  0x58   : > { %4788 = vmatmul.mubr.msk.f32.gmra.mrb[28].mxu1 %vm218_vm0, %v6235_v62 }
  0x59   : > { %5084 = vmatmul.mubr.msk.f32.gmra.mrb[12].mxu0 %vm218_vm0, %v6240_v63  ;;  %4790 = vmatprep.mubr.msk.f32.mxu1 %vm218_vm0, %v6243_v25  ;;  %v3896_v63 = vld [vmem:[%s6997_s1 + $0x90] sm:$0xff]  ;;  %v3898_v25 = vld [vmem:[%s6997_s1 + $0xa0] sm:$0xff] }
  0x5a   : > { %5086 = vmatprep.mubr.msk.f32.mxu0 %vm218_vm0, %v6246_v17  ;;  %v573_v17 = vld [vmem:[%s5850_s22 + $0x9] sm:$0xff]  ;;  %v5341_v35 = vpack.c.bf16 %v3897_v50, %v3896_v63 }
  0x5b   : > { %v6304_v50 = vld [vmem:[%s5850_s22 + $0x10a] sm:$0xff] }
  0x5c   : > { %4791 = vmatmul.mubr.msk.f32.gmra.mrb[30].mxu1 %vm218_vm0, %v6255_v12  ;;  %v6284_v12 = vld [vmem:[%s5850_s22 + $0xf2] sm:$0xff]  ;;  %7092 = vst [vmem:[#allocation30_spill] sm:$0xff] %v6304_v50 }
  0x5d   : > { %5087 = vmatmul.mubr.msk.f32.gmra.mrb[14].mxu0 %vm218_vm0, %v6260_v41  ;;  %4809 = vmatprep.mubr.msk.f32.mxu1 %vm218_vm0, %v572_v38  ;;  %v3899_v38 = vld [vmem:[%s6997_s1 + $0xa8] sm:$0xff] }
  0x5e   : > { %5089 = vmatprep.mubr.msk.f32.mxu0 %vm218_vm0, %v6264_v61  ;;  %v5345_v63 = vpack.c.bf16 %v3899_v38, %v3898_v25  ;;  %v6321_v25 = vld [vmem:[%s5850_s22 + $0x112] sm:$0xff]  ;;  %v3966_v38 = vld [vmem:[%s6997_s1 + $0xc0] sm:$0xff] }
  0x60   : > { %4810 = vmatmul.mubr.msk.f32.vlgmr.msra.gmra.mrb[0].mxu1 %vm218_vm0, %v573_v17  ;;  %v6301_v17 = vld [vmem:[%s5850_s22 + $0xfa] sm:$0xff] }
  0x61   : > { %5090 = vmatmul.mubr.msk.f32.gmra.mrb[16].mxu0 %vm218_vm0, %v6281_v40  ;;  %5340 = vmatpush3.bf16.msra.mxu1 %v6020_v13  ;;  %v3900_v40 = vld [vmem:[%s6997_s1 + $0xb0] sm:$0xff] }
  0x62   : > { %4812 = vmatprep.mubr.msk.f32.mxu1 %vm218_vm0, %v5857_v23  ;;  %5092 = vmatprep.mubr.msk.f32.mxu0 %vm218_vm0, %v6284_v12  ;;  %v3901_v23 = vld [vmem:[%s6997_s1 + $0xb8] sm:$0xff] }
  0x63   : > { %5342 = vmatprep.subr.bf16.mxu1 %v5341_v35  ;;  %v5349_v13 = vpack.c.bf16 %v3901_v23, %v3900_v40  ;;  %v6344_v40 = vld [vmem:[%s5850_s22 + $0x13a] sm:$0xff] }
  0x64   : > { %4813 = vmatmul.mubr.msk.f32.gmra.mrb[2].mxu1 %vm218_vm0, %v5895_v37  ;;  %v6324_v37 = vld [vmem:[%s5850_s22 + $0x122] sm:$0xff] }
  0x65   : > { %5093 = vmatmul.mubr.msk.f32.gmra.mrb[18].mxu0 %vm218_vm0, %v6301_v17  ;;  %4815 = vmatprep.mubr.msk.f32.mxu1 %vm218_vm0, %v5901_v39  ;;  %7093 = vst [vmem:[#allocation31_spill] sm:$0xff] %v6324_v37 }
  0x66   : > { %5095 = vmatprep.mubr.msk.f32.mxu0 %vm218_vm0, %v6304_v50  ;;  %5344 = vmatpush3.bf16.msra.mxu1 %v5341_v35  ;;  %v3967_v50 = vld [vmem:[%s6997_s1 + $0xc8] sm:$0xff] }
  0x67   : > { %5346 = vmatprep.subr.bf16.mxu1 %v5345_v63  ;;  %v6341_v35 = vld [vmem:[%s5850_s22 + $0x12a] sm:$0xff]  ;;  %v6346_v23 = vpack.c.bf16 %v3967_v50, %v3966_v38  ;;  %v6372_v50 = vld [vmem:[%s5850_s22 + $0x15a] sm:$0xff]  ;;  %v6386_v38 = vld [vmem:[%s5850_s22 + $0x172] sm:$0xff] }
  0x68   : > { %4816 = vmatmul.mubr.msk.f32.gmra.mrb[4].mxu1 %vm218_vm0, %v5910_v43  ;;  %7096 = vst [vmem:[#allocation34_spill] sm:$0xff] %v6372_v50  ;;  %7098 = vst [vmem:[#allocation36_spill] sm:$0xff] %v6386_v38 }
  0x69   : > { %5096 = vmatmul.mubr.msk.f32.gmra.mrb[20].mxu0 %vm218_vm0, %v6321_v25  ;;  %4818 = vmatprep.mubr.msk.f32.mxu1 %vm218_vm0, %v5932_v49 }
  0x6a   : > { %5098 = vmatprep.mubr.msk.f32.mxu0 %vm218_vm0, %v6324_v37  ;;  %5348 = vmatpush3.bf16.msra.mxu1 %v5345_v63  ;;  %v6357_v63 = vld [vmem:[%s5850_s22 + $0x142] sm:$0xff]  ;;  %v6360_v37 = vld [vmem:[%s5850_s22 + $0x152] sm:$0xff] }
  0x6b   : > { %5350 = vmatprep.subr.bf16.mxu1 %v5349_v13  ;;  %7094 = vst [vmem:[#allocation32_spill] sm:$0xff] %v6357_v63  ;;  %7095 = vst [vmem:[#allocation33_spill] sm:$0xff] %v6360_v37 }
  0x6c   : > { %4819 = vmatmul.mubr.msk.f32.gmra.mrb[6].mxu1 %vm218_vm0, %v5952_v55 }
  0x6d   : > { %5099 = vmatmul.mubr.msk.f32.gmra.mrb[22].mxu0 %vm218_vm0, %v6341_v35  ;;  %4821 = vmatprep.mubr.msk.f32.mxu1 %vm218_vm0, %v5958_v57 }
  0x6e   : > { %5101 = vmatprep.mubr.msk.f32.mxu0 %vm218_vm0, %v6344_v40  ;;  %5352 = vmatpush3.bf16.msra.mxu1 %v5349_v13  ;;  %v6375_v13 = vld [vmem:[%s5850_s22 + $0x16a] sm:$0xff] }
  0x6f   : > { %5354 = vmatprep.subr.bf16.mxu1 %v6346_v23  ;;  %7097 = vst [vmem:[#allocation35_spill] sm:$0xff] %v6375_v13 }
  0x70   : > { %4822 = vmatmul.mubr.msk.f32.gmra.mrb[8].mxu1 %vm218_vm0, %v5984_v0 }
  0x71   : > { %5102 = vmatmul.mubr.msk.f32.gmra.mrb[24].mxu0 %vm218_vm0, %v6357_v63  ;;  %4824 = vmatprep.mubr.msk.f32.mxu1 %vm218_vm0, %v5990_v3  ;;  %v4258_v63 = vld [vmem:[%s6997_s1 + $0x1e0] sm:$0xff] }
  0x72   : > { %5104 = vmatprep.mubr.msk.f32.mxu0 %vm218_vm0, %v6360_v37  ;;  %v6389_v37 = vld [vmem:[%s5850_s22 + $0x182] sm:$0xff] }
  0x73   : > { %7099 = vst [vmem:[#allocation37_spill] sm:$0xff] %v6389_v37 }
  0x74   : > { %4825 = vmatmul.mubr.msk.f32.gmra.mrb[10].mxu1 %vm218_vm0, %v6004_v6 }
  0x75   : > { %5105 = vmatmul.mubr.msk.f32.gmra.mrb[26].mxu0 %vm218_vm0, %v6372_v50  ;;  %4827 = vmatprep.mubr.msk.f32.mxu1 %vm218_vm0, %v6010_v9  ;;  %v6400_v50 = vld [vmem:[%s5850_s22 + $0x18a] sm:$0xff] }
  0x76   : > { %5107 = vmatprep.mubr.msk.f32.mxu0 %vm218_vm0, %v6375_v13  ;;  %7100 = vst [vmem:[#allocation38_spill] sm:$0xff] %v6400_v50  ;;  %v4256_v13 = vld [vmem:[%s6997_s1 + $0x1d0] sm:$0xff] }
  0x78   : > { %4828 = vmatmul.mubr.msk.f32.gmra.mrb[12].mxu1 %vm218_vm0, %v6032_v15 }
  0x79   : > { %5108 = vmatmul.mubr.msk.f32.gmra.mrb[28].mxu0 %vm218_vm0, %v6386_v38  ;;  %4830 = vmatprep.mubr.msk.f32.mxu1 %vm218_vm0, %v6039_v18  ;;  %v4257_v38 = vld [vmem:[%s6997_s1 + $0x1d8] sm:$0xff] }
  0x7a   : > { %5110 = vmatprep.mubr.msk.f32.mxu0 %vm218_vm0, %v6389_v37  ;;  %v6417_v37 = vld [vmem:[%s5850_s22 + $0xd9] sm:$0xff] }
  0x7b   : > { %7101 = vst [vmem:[#allocation39_spill] sm:$0xff] %v6417_v37 }
  0x7c   : > { %4831 = vmatmul.mubr.msk.f32.gmra.mrb[14].mxu1 %vm218_vm0, %v6053_v20  ;;  %v5421_v20 = vpack.c.bf16 %v4257_v38, %v4256_v13  ;;  %v6432_v13 = vld [vmem:[%s5850_s22 + $0xe1] sm:$0xff]  ;;  %v6438_v38 = vld [vmem:[%s5850_s22 + $0xf1] sm:$0xff] }
  0x7d   : > { %5111 = vmatmul.mubr.msk.f32.gmra.mrb[30].mxu0 %vm218_vm0, %v6400_v50  ;;  %4833 = vmatprep.mubr.msk.f32.mxu1 %vm218_vm0, %v6059_v22  ;;  %v4259_v50 = vld [vmem:[%s6997_s1 + $0x1e8] sm:$0xff] }
  0x7e   : > { %5129 = vmatprep.mubr.msk.f32.mxu0 %vm218_vm0, %v5923_v46  ;;  %v5425_v46 = vpack.c.bf16 %v4259_v50, %v4258_v63  ;;  %v6458_v63 = vld [vmem:[%s5850_s22 + $0x109] sm:$0xff] }
  0x80   : > { %4834 = vmatmul.mubr.msk.f32.gmra.mrb[16].mxu1 %vm218_vm0, %v6073_v26 }
  0x81   : > { %5130 = vmatmul.mubr.msk.f32.vlgmr.msra.gmra.mrb[0].mxu0 %vm218_vm0, %v5941_v52  ;;  %4836 = vmatprep.mubr.msk.f32.mxu1 %vm218_vm0, %v6417_v37  ;;  %v4260_v52 = vld [vmem:[%s6997_s1 + $0x1f0] sm:$0xff]  ;;  %v4261_v37 = vld [vmem:[%s6997_s1 + $0x1f8] sm:$0xff] }
  0x82   : > { %5132 = vmatprep.mubr.msk.f32.mxu0 %vm218_vm0, %v5955_v56  ;;  %5420 = vmatpush3.bf16.msra.mxu0 %v6185_v29  ;;  %v6453_v29 = vld [vmem:[%s5850_s22 + $0xf9] sm:$0xff]  ;;  %v5429_v50 = vpack.c.bf16 %v4261_v37, %v4260_v52  ;;  %v4327_v56 = vld [vmem:[%s6997_s1 + $0x208] sm:$0xff] }
  0x83   : > { %5422 = vmatprep.subr.bf16.mxu0 %v5421_v20  ;;  %v6478_v52 = vld [vmem:[%s5850_s22 + $0x121] sm:$0xff] }
  0x84   : > { %4837 = vmatmul.mubr.msk.f32.gmra.mrb[18].mxu1 %vm218_vm0, %v6432_v13 }
  0x85   : > { %5133 = vmatmul.mubr.msk.f32.gmra.mrb[2].mxu0 %vm218_vm0, %v5963_v58  ;;  %4839 = vmatprep.mubr.msk.f32.mxu1 %vm218_vm0, %v6438_v38  ;;  %v4326_v58 = vld [vmem:[%s6997_s1 + $0x200] sm:$0xff] }
  0x86   : > { %5135 = vmatprep.mubr.msk.f32.mxu0 %vm218_vm0, %v5987_v1  ;;  %5424 = vmatpush3.bf16.msra.mxu0 %v5421_v20  ;;  %v6473_v20 = vld [vmem:[%s5850_s22 + $0x111] sm:$0xff]  ;;  %v6480_v37 = vpack.c.bf16 %v4327_v56, %v4326_v58  ;;  %v6504_v56 = vld [vmem:[%s5850_s22 + $0x141] sm:$0xff] }
  0x87   : > { %5426 = vmatprep.subr.bf16.mxu0 %v5425_v46  ;;  %v6509_v58 = vld [vmem:[%s5850_s22 + $0x151] sm:$0xff] }
  0x88   : > { %4840 = vmatmul.mubr.msk.f32.gmra.mrb[20].mxu1 %vm218_vm0, %v6453_v29 }
  0x89   : > { %5136 = vmatmul.mubr.msk.f32.gmra.mrb[4].mxu0 %vm218_vm0, %v5999_v5  ;;  %4842 = vmatprep.mubr.msk.f32.mxu1 %vm218_vm0, %v6458_v63  ;;  %v6489_v5 = vld [vmem:[%s5850_s22 + $0x129] sm:$0xff] }
  0x8a   : > { %5138 = vmatprep.mubr.msk.f32.mxu0 %vm218_vm0, %v6007_v8  ;;  %5428 = vmatpush3.bf16.msra.mxu0 %v5425_v46  ;;  %v6494_v46 = vld [vmem:[%s5850_s22 + $0x139] sm:$0xff] }
  0x8b   : > { %5430 = vmatprep.subr.bf16.mxu0 %v5429_v50 }
  0x8c   : > { %4843 = vmatmul.mubr.msk.f32.gmra.mrb[22].mxu1 %vm218_vm0, %v6473_v20 }
  0x8d   : > { %5139 = vmatmul.mubr.msk.f32.gmra.mrb[6].mxu0 %vm218_vm0, %v6027_v14  ;;  %4845 = vmatprep.mubr.msk.f32.mxu1 %vm218_vm0, %v6478_v52 }
  0x8e   : > { %5141 = vmatprep.mubr.msk.f32.mxu0 %vm218_vm0, %v6035_v16  ;;  %5432 = vmatpush3.bf16.msra.mxu0 %v5429_v50  ;;  %v6518_v50 = vld [vmem:[%s5850_s22 + $0x159] sm:$0xff]  ;;  %v3971_v16 = vld [vmem:[%s6997_s1 + $0xe8] sm:$0xff] }
  0x8f   : > { %5434 = vmatprep.subr.bf16.mxu0 %v6480_v37 }
  0x90   : > { %4846 = vmatmul.mubr.msk.f32.gmra.mrb[24].mxu1 %vm218_vm0, %v6489_v5 }
  0x91   : > { %5142 = vmatmul.mubr.msk.f32.gmra.mrb[8].mxu0 %vm218_vm0, %v6048_v19  ;;  %4848 = vmatprep.mubr.msk.f32.mxu1 %vm218_vm0, %v6494_v46  ;;  %v6523_v19 = vld [vmem:[%s5850_s22 + $0x169] sm:$0xff] }
  0x92   : > { %5144 = vmatprep.mubr.msk.f32.mxu0 %vm218_vm0, %v6056_v21  ;;  %7102 = vst [vmem:[#allocation40_spill] sm:$0xff] %v6523_v19  ;;  %v966_v21 = vld [vmem:[%s5850_s22 + $0x2] sm:$0xff] }
  0x94   : > { %4849 = vmatmul.mubr.msk.f32.gmra.mrb[26].mxu1 %vm218_vm0, %v6504_v56 }
  0x95   : > { %5145 = vmatmul.mubr.msk.f32.gmra.mrb[10].mxu0 %vm218_vm0, %v6068_v24  ;;  %4851 = vmatprep.mubr.msk.f32.mxu1 %vm218_vm0, %v6509_v58  ;;  %v6532_v24 = vld [vmem:[%s5850_s22 + $0x171] sm:$0xff] }
  0x96   : > { %5147 = vmatprep.mubr.msk.f32.mxu0 %vm218_vm0, %v6076_v27  ;;  %7103 = vst [vmem:[#allocation41_spill] sm:$0xff] %v6532_v24  ;;  %v3968_v27 = vld [vmem:[%s6997_s1 + $0xd0] sm:$0xff] }
  0x98   : > { %4852 = vmatmul.mubr.msk.f32.gmra.mrb[28].mxu1 %vm218_vm0, %v6518_v50 }
  0x99   : > { %5148 = vmatmul.mubr.msk.f32.gmra.mrb[12].mxu0 %vm218_vm0, %v6094_v31  ;;  %4854 = vmatprep.mubr.msk.f32.mxu1 %vm218_vm0, %v6523_v19  ;;  %v3969_v31 = vld [vmem:[%s6997_s1 + $0xd8] sm:$0xff]  ;;  %v967_v19 = vld [vmem:[%s5850_s22 + $0xa] sm:$0xff] }
  0x9a   : > { %5150 = vmatprep.mubr.msk.f32.mxu0 %vm218_vm0, %v6102_v33  ;;  %v5357_v33 = vpack.c.bf16 %v3969_v31, %v3968_v27  ;;  %v3973_v27 = vld [vmem:[%s6997_s1 + $0xf8] sm:$0xff]  ;;  %v7106_v31 = vld [vmem:[#allocation20_spill] sm:$0xff] }
  0x9c   : > { %4855 = vmatmul.mubr.msk.f32.gmra.mrb[30].mxu1 %vm218_vm0, %v6532_v24  ;;  %v3970_v24 = vld [vmem:[%s6997_s1 + $0xe0] sm:$0xff] }
  0x9d   : > { %5151 = vmatmul.mubr.msk.f32.gmra.mrb[14].mxu0 %vm218_vm0, %v6120_v42  ;;  %4873 = vmatprep.mubr.msk.f32.mxu1 %vm218_vm0, %v966_v21  ;;  %v3972_v21 = vld [vmem:[%s6997_s1 + $0xf0] sm:$0xff] }
  0x9e   : > { %5153 = vmatprep.mubr.msk.f32.mxu0 %vm218_vm0, %v6128_v45 }
  0xa0   : > { %4874 = vmatmul.mubr.msk.f32.vlgmr.msra.gmra.mrb[0].mxu1 %vm218_vm0, %v967_v19  ;;  %v5361_v19 = vpack.c.bf16 %v3971_v16, %v3970_v24  ;;  %v5365_v16 = vpack.c.bf16 %v3973_v27, %v3972_v21  ;;  %v7104_v24 = vld [vmem:[#allocation26_spill] sm:$0xff]  ;;  %v7111_v27 = vld [vmem:[#allocation23_spill] sm:$0xff] }
  0xa1   : > { %5154 = vmatmul.mubr.msk.f32.gmra.mrb[16].mxu0 %vm218_vm0, %v6146_v53  ;;  %5356 = vmatpush3.bf16.msra.mxu1 %v6346_v23  ;;  %v6616_v23 = vld [vmem:[%s5850_s22 + $0x188] sm:$0xff]  ;;  %v7110_v21 = vld [vmem:[#allocation22_spill] sm:$0xff] }
  0xa2   : > { %4876 = vmatprep.mubr.msk.f32.mxu1 %vm218_vm0, %v6079_v28  ;;  %5156 = vmatprep.mubr.msk.f32.mxu0 %vm218_vm0, %v6154_v59  ;;  %v6605_v28 = vld [vmem:[%s5850_s22 + $0x180] sm:$0xff]  ;;  %7109 = vst [vmem:[#allocation20_spill] sm:$0xff] %v6616_v23 }
  0xa3   : > { %5358 = vmatprep.subr.bf16.mxu1 %v5357_v33  ;;  %7105 = vst [vmem:[#allocation42_spill] sm:$0xff] %v6605_v28 }
  0xa4   : > { %4877 = vmatmul.mubr.msk.f32.gmra.mrb[2].mxu1 %vm218_vm0, %v6099_v32  ;;  %v7107_v32 = vld [vmem:[#allocation28_spill] sm:$0xff] }
  0xa5   : > { %5157 = vmatmul.mubr.msk.f32.gmra.mrb[18].mxu0 %vm218_vm0, %v6172_v2  ;;  %4879 = vmatprep.mubr.msk.f32.mxu1 %vm218_vm0, %v6105_v34 }
  0xa6   : > { %5159 = vmatprep.mubr.msk.f32.mxu0 %vm218_vm0, %v6180_v10  ;;  %5360 = vmatpush3.bf16.msra.mxu1 %v5357_v33  ;;  %v7108_v33 = vld [vmem:[#allocation21_spill] sm:$0xff] }
  0xa7   : > { %5362 = vmatprep.subr.bf16.mxu1 %v5361_v19 }
  0xa8   : > { %4880 = vmatmul.mubr.msk.f32.gmra.mrb[4].mxu1 %vm218_vm0, %v6125_v44 }
  0xa9   : > { %5160 = vmatmul.mubr.msk.f32.gmra.mrb[20].mxu0 %vm218_vm0, %v6194_v30  ;;  %4882 = vmatprep.mubr.msk.f32.mxu1 %vm218_vm0, %v6131_v47 }
  0xaa   : > { %5162 = vmatprep.mubr.msk.f32.mxu0 %vm218_vm0, %v6202_v36  ;;  %5364 = vmatpush3.bf16.msra.mxu1 %v5361_v19  ;;  %v4180_v19 = vld [vmem:[%s5850_s22 + $0x198] sm:$0xff] }
  0xab   : > { %5366 = vmatprep.subr.bf16.mxu1 %v5365_v16 }
  0xac   : > { %4883 = vmatmul.mubr.msk.f32.gmra.mrb[6].mxu1 %vm218_vm0, %v6151_v54 }
  0xad   : > { %5163 = vmatmul.mubr.msk.f32.gmra.mrb[22].mxu0 %vm218_vm0, %v6215_v48  ;;  %4885 = vmatprep.mubr.msk.f32.mxu1 %vm218_vm0, %v6157_v60 }
  0xae   : > { %5165 = vmatprep.mubr.msk.f32.mxu0 %vm218_vm0, %v6223_v51  ;;  %5368 = vmatpush3.bf16.msra.mxu1 %v5365_v16  ;;  %v4181_v16 = vld [vmem:[%s5850_s22 + $0x1a0] sm:$0xff] }
  0xaf   : > { %5449 = vmatprep.subr.bf16.mxu1 %v5808_v7 }
  0xb0   : > { %4886 = vmatmul.mubr.msk.f32.gmra.mrb[8].mxu1 %vm218_vm0, %v6177_v4 }
  0xb1   : > { %5166 = vmatmul.mubr.msk.f32.gmra.mrb[24].mxu0 %vm218_vm0, %v6235_v62  ;;  %4888 = vmatprep.mubr.msk.f32.mxu1 %vm218_vm0, %v6183_v11  ;;  %v4331_v62 = vld [vmem:[%s6997_s1 + $0x228] sm:$0xff] }
  0xb2   : > { %5168 = vmatprep.mubr.msk.f32.mxu0 %vm218_vm0, %v7104_v24  ;;  %v4329_v24 = vld [vmem:[%s6997_s1 + $0x218] sm:$0xff] }
  0xb4   : > { %4889 = vmatmul.mubr.msk.f32.gmra.mrb[10].mxu1 %vm218_vm0, %v7106_v31 }
  0xb5   : > { %5169 = vmatmul.mubr.msk.f32.gmra.mrb[26].mxu0 %vm218_vm0, %v7107_v32  ;;  %4891 = vmatprep.mubr.msk.f32.mxu1 %vm218_vm0, %v7108_v33  ;;  %v7112_v32 = vld [vmem:[#allocation25_spill] sm:$0xff] }
  0xb6   : > { %5171 = vmatprep.mubr.msk.f32.mxu0 %vm218_vm0, %v6605_v28  ;;  %v4328_v28 = vld [vmem:[%s6997_s1 + $0x210] sm:$0xff] }
  0xb8   : > { %4892 = vmatmul.mubr.msk.f32.gmra.mrb[12].mxu1 %vm218_vm0, %v7110_v21 }
  0xb9   : > { %5172 = vmatmul.mubr.msk.f32.gmra.mrb[28].mxu0 %vm218_vm0, %v6616_v23  ;;  %4894 = vmatprep.mubr.msk.f32.mxu1 %vm218_vm0, %v7111_v27  ;;  %v7113_v23 = vld [vmem:[#allocation27_spill] sm:$0xff] }
  0xba   : > { %5174 = vmatprep.mubr.msk.f32.mxu0 %vm218_vm0, %v4180_v19  ;;  %v5437_v19 = vpack.c.bf16 %v4329_v24, %v4328_v28  ;;  %v7114_v24 = vld [vmem:[#allocation29_spill] sm:$0xff]  ;;  %v4332_v28 = vld [vmem:[%s6997_s1 + $0x230] sm:$0xff] }
  0xbc   : > { %4895 = vmatmul.mubr.msk.f32.gmra.mrb[14].mxu1 %vm218_vm0, %v7112_v32  ;;  %v4330_v32 = vld [vmem:[%s6997_s1 + $0x220] sm:$0xff] }
  0xbd   : > { %5175 = vmatmul.mubr.msk.f32.gmra.mrb[30].mxu0 %vm218_vm0, %v4181_v16  ;;  %4897 = vmatprep.mubr.msk.f32.mxu1 %vm218_vm0, %v7113_v23  ;;  %v7128_v16 = vld [vmem:[#allocation8_spill] sm:$0xff] }
  0xbe   : > { %5193 = vmatprep.mubr.msk.f32.mxu0 %vm218_vm0, %v5901_v39  ;;  %v5441_v39 = vpack.c.bf16 %v4331_v62, %v4330_v32  ;;  %v7115_v62 = vld [vmem:[#allocation30_spill] sm:$0xff] }
  0xbf   : > { %v7127_v32 = vld [vmem:[#allocation2_spill] sm:$0xff] }
  0xc0   : > { %4898 = vmatmul.mubr.msk.f32.gmra.mrb[16].mxu1 %vm218_vm0, %v6260_v41 }
  0xc1   : > { %5194 = vmatmul.mubr.msk.f32.vlgmr.msra.gmra.mrb[0].mxu0 %vm218_vm0, %v5910_v43  ;;  %4900 = vmatprep.mubr.msk.f32.mxu1 %vm218_vm0, %v6264_v61  ;;  %v4333_v43 = vld [vmem:[%s6997_s1 + $0x238] sm:$0xff] }
  0xc2   : > { %5196 = vmatprep.mubr.msk.f32.mxu0 %vm218_vm0, %v5932_v49  ;;  %5436 = vmatpush3.bf16.msra.mxu0 %v6480_v37  ;;  %v5445_v49 = vpack.c.bf16 %v4333_v43, %v4332_v28  ;;  %v7124_v37 = vld [vmem:[#allocation5_spill] sm:$0xff]  ;;  %v7132_v28 = vld [vmem:[#allocation4_spill] sm:$0xff]  ;;  %v7133_v43 = vld [vmem:[#allocation11_spill] sm:$0xff] }
  0xc3   : > { %5438 = vmatprep.subr.bf16.mxu0 %v5437_v19 }
  0xc4   : > { %4901 = vmatmul.mubr.msk.f32.gmra.mrb[18].mxu1 %vm218_vm0, %v7114_v24 }
  0xc5   : > { %5197 = vmatmul.mubr.msk.f32.gmra.mrb[2].mxu0 %vm218_vm0, %v5952_v55  ;;  %4903 = vmatprep.mubr.msk.f32.mxu1 %vm218_vm0, %v6284_v12  ;;  %v7116_v55 = vld [vmem:[#allocation31_spill] sm:$0xff] }
  0xc6   : > { %5199 = vmatprep.mubr.msk.f32.mxu0 %vm218_vm0, %v5958_v57  ;;  %5440 = vmatpush3.bf16.msra.mxu0 %v5437_v19  ;;  %v7117_v57 = vld [vmem:[#allocation32_spill] sm:$0xff]  ;;  %v7129_v19 = vld [vmem:[#allocation9_spill] sm:$0xff] }
  0xc7   : > { %5442 = vmatprep.subr.bf16.mxu0 %v5441_v39 }
  0xc8   : > { %4904 = vmatmul.mubr.msk.f32.gmra.mrb[20].mxu1 %vm218_vm0, %v6301_v17 }
  0xc9   : > { %5200 = vmatmul.mubr.msk.f32.gmra.mrb[4].mxu0 %vm218_vm0, %v5984_v0  ;;  %4906 = vmatprep.mubr.msk.f32.mxu1 %vm218_vm0, %v7115_v62  ;;  %v7118_v0 = vld [vmem:[#allocation14_spill] sm:$0xff] }
  0xca   : > { %5202 = vmatprep.mubr.msk.f32.mxu0 %vm218_vm0, %v5990_v3  ;;  %5444 = vmatpush3.bf16.msra.mxu0 %v5441_v39  ;;  %v7119_v3 = vld [vmem:[#allocation33_spill] sm:$0xff]  ;;  %v7131_v39 = vld [vmem:[#allocation10_spill] sm:$0xff] }
  0xcb   : > { %5446 = vmatprep.subr.bf16.mxu0 %v5445_v49 }
  0xcc   : > { %4907 = vmatmul.mubr.msk.f32.gmra.mrb[22].mxu1 %vm218_vm0, %v6321_v25 }
  0xcd   : > { %5203 = vmatmul.mubr.msk.f32.gmra.mrb[6].mxu0 %vm218_vm0, %v6004_v6  ;;  %4909 = vmatprep.mubr.msk.f32.mxu1 %vm218_vm0, %v7116_v55  ;;  %v7120_v6 = vld [vmem:[#allocation34_spill] sm:$0xff] }
  0xce   : > { %5205 = vmatprep.mubr.msk.f32.mxu0 %vm218_vm0, %v6010_v9  ;;  %5448 = vmatpush3.bf16.msra.mxu0 %v5445_v49  ;;  %v7121_v9 = vld [vmem:[#allocation35_spill] sm:$0xff]  ;;  %v7135_v49 = vld [vmem:[#allocation40_spill] sm:$0xff] }
  0xd0   : > { %4910 = vmatmul.mubr.msk.f32.gmra.mrb[24].mxu1 %vm218_vm0, %v6341_v35 }
  0xd1   : > { %5206 = vmatmul.mubr.msk.f32.gmra.mrb[8].mxu0 %vm218_vm0, %v6032_v15  ;;  %4912 = vmatprep.mubr.msk.f32.mxu1 %vm218_vm0, %v6344_v40  ;;  %v7122_v15 = vld [vmem:[#allocation39_spill] sm:$0xff] }
  0xd2   : > { %5208 = vmatprep.mubr.msk.f32.mxu0 %vm218_vm0, %v6039_v18  ;;  %v7123_v18 = vld [vmem:[#allocation36_spill] sm:$0xff] }
  0xd4   : > { %4913 = vmatmul.mubr.msk.f32.gmra.mrb[26].mxu1 %vm218_vm0, %v7117_v57 }
  0xd5   : > { %5209 = vmatmul.mubr.msk.f32.gmra.mrb[10].mxu0 %vm218_vm0, %v7118_v0  ;;  %4915 = vmatprep.mubr.msk.f32.mxu1 %vm218_vm0, %v7119_v3  ;;  %v6765_v0 = vld [vmem:[%s5850_s22 + $0x181] sm:$0xff] }
  0xd6   : > { %5211 = vmatprep.mubr.msk.f32.mxu0 %vm218_vm0, %v6059_v22  ;;  %v7125_v22 = vld [vmem:[#allocation6_spill] sm:$0xff] }
  0xd8   : > { %4916 = vmatmul.mubr.msk.f32.gmra.mrb[28].mxu1 %vm218_vm0, %v7120_v6 }
  0xd9   : > { %5212 = vmatmul.mubr.msk.f32.gmra.mrb[12].mxu0 %vm218_vm0, %v6073_v26  ;;  %4918 = vmatprep.mubr.msk.f32.mxu1 %vm218_vm0, %v7121_v9  ;;  %v7126_v26 = vld [vmem:[#allocation7_spill] sm:$0xff] }
  0xda   : > { %5214 = vmatprep.mubr.msk.f32.mxu0 %vm218_vm0, %v7122_v15 }
  0xdc   : > { %4919 = vmatmul.mubr.msk.f32.gmra.mrb[30].mxu1 %vm218_vm0, %v7123_v18 }
  0xdd   : > { %5215 = vmatmul.mubr.msk.f32.gmra.mrb[14].mxu0 %vm218_vm0, %v6432_v13  ;;  %4937 = vmatprep.mubr.msk.f32.mxu1 %vm218_vm0, %v7124_v37  ;;  %v7137_v37 = vld [vmem:[#allocation41_spill] sm:$0xff] }
  0xde   : > { %5217 = vmatprep.mubr.msk.f32.mxu0 %vm218_vm0, %v6438_v38 }
  0xe0   : > { %4938 = vmatmul.mubr.msk.f32.vlgmr.msra.gmra.mrb[0].mxu1 %vm218_vm0, %v7125_v22  ;;  %v7138_v22 = vld [vmem:[#allocation15_spill] sm:$0xff] }
  0xe1   : > { %5218 = vmatmul.mubr.msk.f32.gmra.mrb[16].mxu0 %vm218_vm0, %v6453_v29  ;;  %5453 = vmatpush3.bf16.msra.mxu1 %v5808_v7  ;;  %v7130_v7 = vld [vmem:[#allocation3_spill] sm:$0xff] }
  0xe2   : > { %4940 = vmatprep.mubr.msk.f32.mxu1 %vm218_vm0, %v7126_v26  ;;  %5220 = vmatprep.mubr.msk.f32.mxu0 %vm218_vm0, %v6458_v63  ;;  %v4252_v26 = vld [vmem:[%s5850_s22 + $0x199] sm:$0xff] }
  0xe3   : > { %5450 = vmatprep.subr.bf16.mxu1 %v7127_v32 }
  0xe4   : > { %4941 = vmatmul.mubr.msk.f32.gmra.mrb[2].mxu1 %vm218_vm0, %v7128_v16  ;;  %v7140_v16 = vld [vmem:[#allocation17_spill] sm:$0xff] }
  0xe5   : > { %5221 = vmatmul.mubr.msk.f32.gmra.mrb[18].mxu0 %vm218_vm0, %v6473_v20  ;;  %4943 = vmatprep.mubr.msk.f32.mxu1 %vm218_vm0, %v7129_v19  ;;  %v4253_v19 = vld [vmem:[%s5850_s22 + $0x1a1] sm:$0xff] }
  0xe6   : > { %5223 = vmatprep.mubr.msk.f32.mxu0 %vm218_vm0, %v6478_v52  ;;  %5454 = vmatpush3.bf16.msra.mxu1 %v7127_v32  ;;  %v7139_v32 = vld [vmem:[#allocation16_spill] sm:$0xff] }
  0xe7   : > { %5451 = vmatprep.subr.bf16.mxu1 %v7130_v7 }
  0xe8   : > { %4944 = vmatmul.mubr.msk.f32.gmra.mrb[4].mxu1 %vm218_vm0, %v7131_v39  ;;  %v7142_v39 = vld [vmem:[#allocation19_spill] sm:$0xff] }
  0xe9   : > { %5224 = vmatmul.mubr.msk.f32.gmra.mrb[20].mxu0 %vm218_vm0, %v6489_v5  ;;  %4946 = vmatprep.mubr.msk.f32.mxu1 %vm218_vm0, %v5987_v1  ;;  %v7134_v1 = vld [vmem:[#allocation12_spill] sm:$0xff] }
  0xea   : > { %5226 = vmatprep.mubr.msk.f32.mxu0 %vm218_vm0, %v6494_v46  ;;  %5455 = vmatpush3.bf16.msra.mxu1 %v7130_v7  ;;  %v7141_v7 = vld [vmem:[#allocation18_spill] sm:$0xff] }
  0xeb   : > { %5452 = vmatprep.subr.bf16.mxu1 %v7132_v28 }
  0xec   : > { %4947 = vmatmul.mubr.msk.f32.gmra.mrb[6].mxu1 %vm218_vm0, %v7133_v43 }
  0xed   : > { %5227 = vmatmul.mubr.msk.f32.gmra.mrb[22].mxu0 %vm218_vm0, %v6504_v56  ;;  %4949 = vmatprep.mubr.msk.f32.mxu1 %vm218_vm0, %v6007_v8  ;;  %v7136_v8 = vld [vmem:[#allocation13_spill] sm:$0xff] }
  0xee   : > { %5229 = vmatprep.mubr.msk.f32.mxu0 %vm218_vm0, %v6509_v58  ;;  %5456 = vmatpush3.bf16.msra.mxu1 %v7132_v28 }
  0xf0   : > { %4950 = vmatmul.mubr.msk.f32.gmra.mrb[8].mxu1 %vm218_vm0, %v6027_v14  ;;  %v6776_v14 = vld [vmem:[%s5850_s22 + $0x189] sm:$0xff] }
  0xf1   : > { %5230 = vmatmul.mubr.msk.f32.gmra.mrb[24].mxu0 %vm218_vm0, %v6518_v50  ;;  %4952 = vmatprep.mubr.msk.f32.mxu1 %vm218_vm0, %v7134_v1 }
  0xf2   : > { %5232 = vmatprep.mubr.msk.f32.mxu0 %vm218_vm0, %v7135_v49 }
  0xf4   : > { %4953 = vmatmul.mubr.msk.f32.gmra.mrb[10].mxu1 %vm218_vm0, %v7136_v8 }
  0xf5   : > { %5233 = vmatmul.mubr.msk.f32.gmra.mrb[26].mxu0 %vm218_vm0, %v7137_v37  ;;  %4955 = vmatprep.mubr.msk.f32.mxu1 %vm218_vm0, %v7138_v22 }
  0xf6   : > { %5235 = vmatprep.mubr.msk.f32.mxu0 %vm218_vm0, %v6765_v0 }
  0xf8   : > { %4956 = vmatmul.mubr.msk.f32.gmra.mrb[12].mxu1 %vm218_vm0, %v7139_v32 }
  0xf9   : > { %5236 = vmatmul.mubr.msk.f32.gmra.mrb[28].mxu0 %vm218_vm0, %v6776_v14  ;;  %4958 = vmatprep.mubr.msk.f32.mxu1 %vm218_vm0, %v7140_v16 }
  0xfa   : > { %5238 = vmatprep.mubr.msk.f32.mxu0 %vm218_vm0, %v4252_v26 }
  0xfc   : > { %4959 = vmatmul.mubr.msk.f32.gmra.mrb[14].mxu1 %vm218_vm0, %v7141_v7 }
  0xfd   : > { %5239 = vmatmul.mubr.msk.f32.gmra.mrb[30].mxu0 %vm218_vm0, %v4253_v19  ;;  %4961 = vmatprep.mubr.msk.f32.mxu1 %vm218_vm0, %v7142_v39 }
  0xfe   : > { %5257 = vmatprep.mubr.msk.f32.mxu0 %vm218_vm0, %v6105_v34  ;;  %v7143_v34 = vld [vmem:[#allocation24_spill] sm:$0xff] }
 0x100   : > { %4962 = vmatmul.mubr.msk.f32.gmra.mrb[16].mxu1 %vm218_vm0, %v6120_v42  ;;  %v7144_v42 = vld [vmem:[#allocation25_spill] sm:$0xff] }
 0x101   : > { %5258 = vmatmul.mubr.msk.f32.vlgmr.msra.gmra.mrb[0].mxu0 %vm218_vm0, %v6125_v44  ;;  %4964 = vmatprep.mubr.msk.f32.mxu1 %vm218_vm0, %v6128_v45  ;;  %v7145_v44 = vld [vmem:[#allocation26_spill] sm:$0xff]  ;;  %v7146_v45 = vld [vmem:[#allocation28_spill] sm:$0xff] }
 0x102   : > { %5260 = vmatprep.mubr.msk.f32.mxu0 %vm218_vm0, %v6131_v47  ;;  %v7147_v47 = vld [vmem:[#allocation42_spill] sm:$0xff] }
 0x104   : > { %4965 = vmatmul.mubr.msk.f32.gmra.mrb[18].mxu1 %vm218_vm0, %v6146_v53  ;;  %v7148_v53 = vld [vmem:[#allocation20_spill] sm:$0xff] }
 0x105   : > { %5261 = vmatmul.mubr.msk.f32.gmra.mrb[2].mxu0 %vm218_vm0, %v6151_v54  ;;  %4967 = vmatprep.mubr.msk.f32.mxu1 %vm218_vm0, %v6154_v59  ;;  %v4325_v54 = vld [vmem:[%s5850_s22 + $0x1a2] sm:$0xff] }
 0x106   : > { %5263 = vmatprep.mubr.msk.f32.mxu0 %vm218_vm0, %v6157_v60 }
 0x108   : > { %4968 = vmatmul.mubr.msk.f32.gmra.mrb[20].mxu1 %vm218_vm0, %v6172_v2 }
 0x109   : > { %5264 = vmatmul.mubr.msk.f32.gmra.mrb[4].mxu0 %vm218_vm0, %v6177_v4  ;;  %4970 = vmatprep.mubr.msk.f32.mxu1 %vm218_vm0, %v6180_v10 }
 0x10a   : > { %5266 = vmatprep.mubr.msk.f32.mxu0 %vm218_vm0, %v6183_v11 }
 0x10c   : > { %4971 = vmatmul.mubr.msk.f32.gmra.mrb[22].mxu1 %vm218_vm0, %v6194_v30 }
 0x10d   : > { %5267 = vmatmul.mubr.msk.f32.gmra.mrb[6].mxu0 %vm218_vm0, %v7106_v31  ;;  %4973 = vmatprep.mubr.msk.f32.mxu1 %vm218_vm0, %v6202_v36 }
 0x10e   : > { %5269 = vmatprep.mubr.msk.f32.mxu0 %vm218_vm0, %v7108_v33 }
 0x110   : > { %4974 = vmatmul.mubr.msk.f32.gmra.mrb[24].mxu1 %vm218_vm0, %v6215_v48 }
 0x111   : > { %5270 = vmatmul.mubr.msk.f32.gmra.mrb[8].mxu0 %vm218_vm0, %v7110_v21  ;;  %4976 = vmatprep.mubr.msk.f32.mxu1 %vm218_vm0, %v6223_v51 }
 0x112   : > { %5272 = vmatprep.mubr.msk.f32.mxu0 %vm218_vm0, %v7111_v27 }
 0x114   : > { %4977 = vmatmul.mubr.msk.f32.gmra.mrb[26].mxu1 %vm218_vm0, %v7143_v34 }
 0x115   : > { %5273 = vmatmul.mubr.msk.f32.gmra.mrb[10].mxu0 %vm218_vm0, %v7144_v42  ;;  %4979 = vmatprep.mubr.msk.f32.mxu1 %vm218_vm0, %v7145_v44 }
 0x116   : > { %5275 = vmatprep.mubr.msk.f32.mxu0 %vm218_vm0, %v7113_v23 }
 0x118   : > { %4980 = vmatmul.mubr.msk.f32.gmra.mrb[28].mxu1 %vm218_vm0, %v7146_v45 }
 0x119   : > { %5276 = vmatmul.mubr.msk.f32.gmra.mrb[12].mxu0 %vm218_vm0, %v6260_v41  ;;  %4982 = vmatprep.mubr.msk.f32.mxu1 %vm218_vm0, %v7147_v47  ;;  %v4324_v41 = vld [vmem:[%s5850_s22 + $0x19a] sm:$0xff] }
 0x11a   : > { %5278 = vmatprep.mubr.msk.f32.mxu0 %vm218_vm0, %v6264_v61 }
 0x11c   : > { %4983 = vmatmul.mubr.msk.f32.gmra.mrb[30].mxu1 %vm218_vm0, %v7148_v53 }
 0x11d   : > { %5279 = vmatmul.mubr.msk.f32.gmra.mrb[14].mxu0 %vm218_vm0, %v7114_v24  ;;  %5025 = vmatprep.mubr.msk.f32.mxu1 %vm218_vm0, %v7122_v15 }
 0x11e   : > { %5281 = vmatprep.mubr.msk.f32.mxu0 %vm218_vm0, %v6284_v12  ;;  %v7149_v12 = vld [vmem:[#allocation37_spill] sm:$0xff] }
 0x120   : > { %5026 = vmatmul.mubr.msk.f32.vlgmr.msra.gmra.mrb[16].mxu1 %vm218_vm0, %v6432_v13  ;;  %v6921_v13 = vld [vmem:[%s6998_s2] ss:$0 sm:$0xff] }
 0x121   : > { %5282 = vmatmul.mubr.msk.f32.gmra.mrb[16].mxu0 %vm218_vm0, %v6301_v17  ;;  %5028 = vmatprep.mubr.msk.f32.mxu1 %vm218_vm0, %v6438_v38 }
 0x122   : > { %5284 = vmatprep.mubr.msk.f32.mxu0 %vm218_vm0, %v7115_v62 }
 0x124   : > { %5029 = vmatmul.mubr.msk.f32.gmra.mrb[18].mxu1 %vm218_vm0, %v6453_v29 }
 0x125   : > { %5285 = vmatmul.mubr.msk.f32.gmra.mrb[18].mxu0 %vm218_vm0, %v6321_v25  ;;  %5031 = vmatprep.mubr.msk.f32.mxu1 %vm218_vm0, %v6458_v63 }
 0x126   : > { %5287 = vmatprep.mubr.msk.f32.mxu0 %vm218_vm0, %v7116_v55 }
 0x128   : > { %5032 = vmatmul.mubr.msk.f32.gmra.mrb[20].mxu1 %vm218_vm0, %v6473_v20 }
 0x129   : > { %5288 = vmatmul.mubr.msk.f32.gmra.mrb[20].mxu0 %vm218_vm0, %v6341_v35  ;;  %5034 = vmatprep.mubr.msk.f32.mxu1 %vm218_vm0, %v6478_v52 }
 0x12a   : > { %5290 = vmatprep.mubr.msk.f32.mxu0 %vm218_vm0, %v6344_v40 }
 0x12c   : > { %5035 = vmatmul.mubr.msk.f32.gmra.mrb[22].mxu1 %vm218_vm0, %v6489_v5  ;;  %v7150_v5 = vld [vmem:[#allocation38_spill] sm:$0xff] }
 0x12d   : > { %5291 = vmatmul.mubr.msk.f32.gmra.mrb[22].mxu0 %vm218_vm0, %v7117_v57  ;;  %5037 = vmatprep.mubr.msk.f32.mxu1 %vm218_vm0, %v6494_v46 }
 0x12e   : > { %5293 = vmatprep.mubr.msk.f32.mxu0 %vm218_vm0, %v7119_v3 }
 0x130   : > { %5038 = vmatmul.mubr.msk.f32.gmra.mrb[24].mxu1 %vm218_vm0, %v6504_v56 }
 0x131   : > { %5294 = vmatmul.mubr.msk.f32.gmra.mrb[24].mxu0 %vm218_vm0, %v7120_v6  ;;  %5040 = vmatprep.mubr.msk.f32.mxu1 %vm218_vm0, %v6509_v58 }
 0x132   : > { %5296 = vmatprep.mubr.msk.f32.mxu0 %vm218_vm0, %v7121_v9 }
 0x134   : > { %5041 = vmatmul.mubr.msk.f32.gmra.mrb[26].mxu1 %vm218_vm0, %v6518_v50 }
 0x135   : > { %5297 = vmatmul.mubr.msk.f32.gmra.mrb[26].mxu0 %vm218_vm0, %v7123_v18  ;;  %5043 = vmatprep.mubr.msk.f32.mxu1 %vm218_vm0, %v7135_v49 }
 0x136   : > { %5299 = vmatprep.mubr.msk.f32.mxu0 %vm218_vm0, %v7149_v12 }
 0x138   : > { %5044 = vmatmul.mubr.msk.f32.gmra.mrb[28].mxu1 %vm218_vm0, %v7137_v37 }
 0x139   : > { %5300 = vmatmul.mubr.msk.f32.gmra.mrb[28].mxu0 %vm218_vm0, %v7150_v5  ;;  %5046 = vmatprep.mubr.msk.f32.mxu1 %vm218_vm0, %v6765_v0 }
 0x13a   : > { %5302 = vmatprep.mubr.msk.f32.mxu0 %vm218_vm0, %v4324_v41 }
 0x13c   : > { %5047 = vmatmul.mubr.msk.f32.gmra.mrb[30].mxu1 %vm218_vm0, %v6776_v14 }
 0x13d   : > { %5303 = vmatmul.mubr.msk.f32.gmra.mrb[30].mxu0 %vm218_vm0, %v4325_v54 }
 0x1b3   : > { %v4939_v59 = vpop.f32.mrb[0].mxu1 }
 0x1b4   : > { %v1564_v60 = vpop.f32.mrb[1].mxu1  ;;  %v5457_v29 = vadd.f32 %v4939_v59, %v6921_v13 }
 0x1b5   : > { %v5459_v63 = vadd.f32 %v6921_v13, %v1564_v60 }
 0x1b7   : > { %v4942_v2 = vpop.f32.mrb[2].mxu1 }
 0x1b8   : > { %v1574_v4 = vpop.f32.mrb[3].mxu1  ;;  %v5461_v58 = vadd.f32 %v4942_v2, %v6921_v13 }
 0x1b9   : > { %v5463_v50 = vadd.f32 %v6921_v13, %v1574_v4 }
 0x1bb   : > { %v4945_v10 = vpop.f32.mrb[4].mxu1 }
 0x1bc   : > { %v1584_v11 = vpop.f32.mrb[5].mxu1  ;;  %v5465_v27 = vadd.f32 %v4945_v10, %v6921_v13 }
 0x1bd   : > { %v5467_v24 = vadd.f32 %v6921_v13, %v1584_v11 }
 0x1bf   : > { %v4948_v30 = vpop.f32.mrb[6].mxu1 }
 0x1c0   : > { %v1594_v36 = vpop.f32.mrb[7].mxu1  ;;  %v5469_v6 = vadd.f32 %v4948_v30, %v6921_v13 }
 0x1c1   : > { %v5471_v9 = vadd.f32 %v6921_v13, %v1594_v36 }
 0x1c3   : > { %v4951_v48 = vpop.f32.mrb[8].mxu1 }
 0x1c4   : > { %v1604_v51 = vpop.f32.mrb[9].mxu1  ;;  %v5473_v1 = vadd.f32 %v4951_v48, %v6921_v13 }
 0x1c5   : > { %v5475_v49 = vadd.f32 %v6921_v13, %v1604_v51 }
 0x1c7   : > { %v4954_v61 = vpop.f32.mrb[10].mxu1 }
 0x1c8   : > { %v1614_v17 = vpop.f32.mrb[11].mxu1  ;;  %v5477_v14 = vadd.f32 %v4954_v61, %v6921_v13 }
 0x1c9   : > { %v5479_v26 = vadd.f32 %v6921_v13, %v1614_v17 }
 0x1cb   : > { %v4957_v25 = vpop.f32.mrb[12].mxu1 }
 0x1cc   : > { %v1624_v35 = vpop.f32.mrb[13].mxu1  ;;  %v5481_v39 = vadd.f32 %v4957_v25, %v6921_v13 }
 0x1cd   : > { %v5483_v34 = vadd.f32 %v6921_v13, %v1624_v35 }
 0x1cf   : > { %v4960_v40 = vpop.f32.mrb[14].mxu1 }
 0x1d0   : > { %v1634_v38 = vpop.f32.mrb[15].mxu1  ;;  %v5485_v53 = vadd.f32 %v4960_v40, %v6921_v13 }
 0x1d1   : > { %v5487_v12 = vadd.f32 %v6921_v13, %v1634_v38 }
 0x1d4   : > { %v5259_v20 = vpop.f32.mrb[0].mxu0 }
 0x1d5   : > { %v5458_v52 = vadd.f32 %v5457_v29, %v5259_v20  ;;  %v3535_v46 = vpop.f32.mrb[1].mxu0 }
 0x1d6   : > { %v5460_v56 = vadd.f32 %v5459_v63, %v3535_v46 }
 0x1d7   : > { %3727 = vst [vmem:[%s6929_s20 + $0x8] sm:$0xff] %v5458_v52 }
 0x1d8   : > { %3726 = vst [vmem:[%s6929_s20] sm:$0xff] %v5460_v56  ;;  %v5262_v31 = vpop.f32.mrb[2].mxu0 }
 0x1d9   : > { %v5462_v33 = vadd.f32 %v5461_v58, %v5262_v31  ;;  %v3545_v23 = vpop.f32.mrb[3].mxu0 }
 0x1da   : > { %v5464_v21 = vadd.f32 %v5463_v50, %v3545_v23 }
 0x1db   : > { %3729 = vst [vmem:[%s6929_s20 + $0x18] sm:$0xff] %v5462_v33 }
 0x1dc   : > { %3728 = vst [vmem:[%s6929_s20 + $0x10] sm:$0xff] %v5464_v21  ;;  %v5265_v62 = vpop.f32.mrb[4].mxu0 }
 0x1dd   : > { %v5466_v55 = vadd.f32 %v5465_v27, %v5265_v62  ;;  %v3555_v57 = vpop.f32.mrb[5].mxu0 }
 0x1de   : > { %v5468_v3 = vadd.f32 %v5467_v24, %v3555_v57 }
 0x1df   : > { %3731 = vst [vmem:[%s6929_s20 + $0x28] sm:$0xff] %v5466_v55 }
 0x1e0   : > { %3730 = vst [vmem:[%s6929_s20 + $0x20] sm:$0xff] %v5468_v3  ;;  %v5268_v15 = vpop.f32.mrb[6].mxu0 }
 0x1e1   : > { %v5470_v18 = vadd.f32 %v5469_v6, %v5268_v15  ;;  %v3565_v28 = vpop.f32.mrb[7].mxu0 }
 0x1e2   : > { %v5472_v43 = vadd.f32 %v5471_v9, %v3565_v28 }
 0x1e3   : > { %3733 = vst [vmem:[%s6929_s20 + $0x38] sm:$0xff] %v5470_v18 }
 0x1e4   : > { %3732 = vst [vmem:[%s6929_s20 + $0x30] sm:$0xff] %v5472_v43  ;;  %v5271_v0 = vpop.f32.mrb[8].mxu0 }
 0x1e5   : > { %v5474_v8 = vadd.f32 %v5473_v1, %v5271_v0  ;;  %v3575_v37 = vpop.f32.mrb[9].mxu0 }
 0x1e6   : > { %v5476_v22 = vadd.f32 %v5475_v49, %v3575_v37 }
 0x1e7   : > { %3735 = vst [vmem:[%s6929_s20 + $0x48] sm:$0xff] %v5474_v8 }
 0x1e8   : > { %3734 = vst [vmem:[%s6929_s20 + $0x40] sm:$0xff] %v5476_v22  ;;  %v5274_v32 = vpop.f32.mrb[10].mxu0 }
 0x1e9   : > { %v5478_v16 = vadd.f32 %v5477_v14, %v5274_v32  ;;  %v3585_v19 = vpop.f32.mrb[11].mxu0 }
 0x1ea   : > { %v5480_v7 = vadd.f32 %v5479_v26, %v3585_v19 }
 0x1eb   : > { %3737 = vst [vmem:[%s6929_s20 + $0x58] sm:$0xff] %v5478_v16 }
 0x1ec   : > { %3736 = vst [vmem:[%s6929_s20 + $0x50] sm:$0xff] %v5480_v7  ;;  %v5277_v42 = vpop.f32.mrb[12].mxu0 }
 0x1ed   : > { %v5482_v44 = vadd.f32 %v5481_v39, %v5277_v42  ;;  %v3595_v45 = vpop.f32.mrb[13].mxu0 }
 0x1ee   : > { %v5484_v47 = vadd.f32 %v5483_v34, %v3595_v45 }
 0x1ef   : > { %3739 = vst [vmem:[%s6929_s20 + $0x68] sm:$0xff] %v5482_v44 }
 0x1f0   : > { %3738 = vst [vmem:[%s6929_s20 + $0x60] sm:$0xff] %v5484_v47  ;;  %v5280_v41 = vpop.f32.mrb[14].mxu0 }
 0x1f1   : > { %v5486_v5 = vadd.f32 %v5485_v53, %v5280_v41  ;;  %v3605_v54 = vpop.f32.mrb[15].mxu0 }
 0x1f2   : > { %v5488_v59 = vadd.f32 %v5487_v12, %v3605_v54 }
 0x1f3   : > { %3741 = vst [vmem:[%s6929_s20 + $0x78] sm:$0xff] %v5486_v5  ;;  %v5027_v60 = vpop.f32.mrb[16].mxu1 }
 0x1f4   : > { %3740 = vst [vmem:[%s6929_s20 + $0x70] sm:$0xff] %v5488_v59  ;;  %v5489_v2 = vadd.f32 %v5027_v60, %v6921_v13  ;;  %v5283_v4 = vpop.f32.mrb[16].mxu0  ;;  %v2038_v10 = vpop.f32.mrb[17].mxu1 }
 0x1f5   : > { %v5491_v11 = vadd.f32 %v6921_v13, %v2038_v10  ;;  %v3615_v30 = vpop.f32.mrb[17].mxu0 }
 0x1f6   : > { %v5490_v36 = vadd.f32 %v5489_v2, %v5283_v4 }
 0x1f7   : > { %v5492_v48 = vadd.f32 %v5491_v11, %v3615_v30  ;;  %v5030_v51 = vpop.f32.mrb[18].mxu1 }
 0x1f8   : > { %3743 = vst [vmem:[%s6929_s20 + $0x88] sm:$0xff] %v5490_v36  ;;  %v5493_v61 = vadd.f32 %v5030_v51, %v6921_v13  ;;  %v5286_v17 = vpop.f32.mrb[18].mxu0  ;;  %v2048_v25 = vpop.f32.mrb[19].mxu1 }
 0x1f9   : > { %3742 = vst [vmem:[%s6929_s20 + $0x80] sm:$0xff] %v5492_v48  ;;  %v5495_v35 = vadd.f32 %v6921_v13, %v2048_v25  ;;  %v3625_v40 = vpop.f32.mrb[19].mxu0 }
 0x1fa   : > { %v5494_v38 = vadd.f32 %v5493_v61, %v5286_v17 }
 0x1fb   : > { %v5496_v29 = vadd.f32 %v5495_v35, %v3625_v40  ;;  %v5033_v63 = vpop.f32.mrb[20].mxu1 }
 0x1fc   : > { %3745 = vst [vmem:[%s6929_s20 + $0x98] sm:$0xff] %v5494_v38  ;;  %v5497_v20 = vadd.f32 %v5033_v63, %v6921_v13  ;;  %v5289_v52 = vpop.f32.mrb[20].mxu0  ;;  %v2058_v46 = vpop.f32.mrb[21].mxu1 }
 0x1fd   : > { %3744 = vst [vmem:[%s6929_s20 + $0x90] sm:$0xff] %v5496_v29  ;;  %v5499_v56 = vadd.f32 %v6921_v13, %v2058_v46  ;;  %v3635_v58 = vpop.f32.mrb[21].mxu0 }
 0x1fe   : > { %v5498_v50 = vadd.f32 %v5497_v20, %v5289_v52 }
 0x1ff   : > { %v5500_v31 = vadd.f32 %v5499_v56, %v3635_v58  ;;  %v5036_v33 = vpop.f32.mrb[22].mxu1 }
 0x200   : > { %3747 = vst [vmem:[%s6929_s20 + $0xa8] sm:$0xff] %v5498_v50  ;;  %v5501_v23 = vadd.f32 %v5036_v33, %v6921_v13  ;;  %v5292_v21 = vpop.f32.mrb[22].mxu0  ;;  %v2068_v27 = vpop.f32.mrb[23].mxu1 }
 0x201   : > { %3746 = vst [vmem:[%s6929_s20 + $0xa0] sm:$0xff] %v5500_v31  ;;  %v5503_v24 = vadd.f32 %v6921_v13, %v2068_v27  ;;  %v3645_v62 = vpop.f32.mrb[23].mxu0 }
 0x202   : > { %v5502_v55 = vadd.f32 %v5501_v23, %v5292_v21 }
 0x203   : > { %v5504_v57 = vadd.f32 %v5503_v24, %v3645_v62  ;;  %v5039_v3 = vpop.f32.mrb[24].mxu1 }
 0x204   : > { %3749 = vst [vmem:[%s6929_s20 + $0xb8] sm:$0xff] %v5502_v55  ;;  %v5505_v6 = vadd.f32 %v5039_v3, %v6921_v13  ;;  %v5295_v9 = vpop.f32.mrb[24].mxu0  ;;  %v2078_v15 = vpop.f32.mrb[25].mxu1 }
 0x205   : > { %3748 = vst [vmem:[%s6929_s20 + $0xb0] sm:$0xff] %v5504_v57  ;;  %v5507_v18 = vadd.f32 %v6921_v13, %v2078_v15  ;;  %v3655_v28 = vpop.f32.mrb[25].mxu0 }
 0x206   : > { %v5506_v43 = vadd.f32 %v5505_v6, %v5295_v9 }
 0x207   : > { %v5508_v1 = vadd.f32 %v5507_v18, %v3655_v28  ;;  %v5042_v49 = vpop.f32.mrb[26].mxu1 }
 0x208   : > { %3751 = vst [vmem:[%s6929_s20 + $0xc8] sm:$0xff] %v5506_v43  ;;  %v5509_v0 = vadd.f32 %v5042_v49, %v6921_v13  ;;  %v5298_v8 = vpop.f32.mrb[26].mxu0  ;;  %v2088_v37 = vpop.f32.mrb[27].mxu1 }
 0x209   : > { %3750 = vst [vmem:[%s6929_s20 + $0xc0] sm:$0xff] %v5508_v1  ;;  %v5511_v22 = vadd.f32 %v6921_v13, %v2088_v37  ;;  %v3665_v14 = vpop.f32.mrb[27].mxu0 }
 0x20a   : > { %v5510_v26 = vadd.f32 %v5509_v0, %v5298_v8 }
 0x20b   : > { %v5512_v32 = vadd.f32 %v5511_v22, %v3665_v14  ;;  %v5045_v16 = vpop.f32.mrb[28].mxu1 }
 0x20c   : > { %3753 = vst [vmem:[%s6929_s20 + $0xd8] sm:$0xff] %v5510_v26  ;;  %v5513_v19 = vadd.f32 %v5045_v16, %v6921_v13  ;;  %v5301_v7 = vpop.f32.mrb[28].mxu0  ;;  %v2098_v39 = vpop.f32.mrb[29].mxu1 }
 0x20d   : > { %3752 = vst [vmem:[%s6929_s20 + $0xd0] sm:$0xff] %v5512_v32  ;;  %v5515_v34 = vadd.f32 %v6921_v13, %v2098_v39  ;;  %v3675_v42 = vpop.f32.mrb[29].mxu0 }
 0x20e   : > { %v5514_v44 = vadd.f32 %v5513_v19, %v5301_v7 }
 0x20f   : > { %v5516_v45 = vadd.f32 %v5515_v34, %v3675_v42  ;;  %v5048_v47 = vpop.f32.mrb[30].mxu1 }
 0x210   : > { %3755 = vst [vmem:[%s6929_s20 + $0xe8] sm:$0xff] %v5514_v44  ;;  %v5517_v53 = vadd.f32 %v5048_v47, %v6921_v13  ;;  %v5304_v12 = vpop.f32.mrb[30].mxu0  ;;  %v2108_v41 = vpop.f32.mrb[31].mxu1 }
 0x211   : > { %3754 = vst [vmem:[%s6929_s20 + $0xe0] sm:$0xff] %v5516_v45  ;;  %v5519_v5 = vadd.f32 %v6921_v13, %v2108_v41  ;;  %v3685_v54 = vpop.f32.mrb[31].mxu0 }
 0x212   : > { %v5518_v59 = vadd.f32 %v5517_v53, %v5304_v12 }
 0x213   : > { %v5520_v60 = vadd.f32 %v5519_v5, %v3685_v54 }
 0x214   : > { %3757 = vst [vmem:[%s6929_s20 + $0xf8] sm:$0xff] %v5518_v59 }
 0x215   : > { %3756 = vst [vmem:[%s6929_s20 + $0xf0] sm:$0xff] %v5520_v60 }
 0x216 PF: > { %s13_s12 = sadd.s32 1, %s5760_s12  }
 0x217   : > { %p10_p4 = scmp.ge.s32.totalorder %s13_s12, 4  }
 0x219   :  { %12 = sbr.rel (!%p10_p4) target bundleno = 1 (0x1), region = 72 }

</bundles_post_ra>
